<compile_context>
chip_gen: v7x
topology: tpu7x:2x2x1
jax: 0.10.0
libtpu: 0.0.40
codegen_flags: <defaults>
</compile_context>

<pallas_src>
import jax
import jax.numpy as jnp
import numpy as np
from jax.experimental import pallas as pl
from jax.experimental.pallas import tpu as pltpu

# ----------------------------- small synthetic config ------------------------
B, S = 2, 8          # batch, sequence length
H = 32               # hidden size
NH = 2               # attention heads
HD = H // NH         # head dim
FFN = 64             # intermediate size
LAYERS = 2           # encoder layers
VOCAB = 50           # word vocab
TYPE_VOCAB = 3       # CrossEncoder expands type vocab to 3
MAX_POS = 16
EPS = 1e-12          # BERT LayerNorm eps
T_SCALE = 1.0        # self.t = 1
ATTN_SCALE = 1.0 / float(HD) ** 0.5
BS = B * S
assert S & (S - 1) == 0  # in-kernel position index uses `row & (S-1)`

# ----------------------------- packed-slab layout -----------------------------
# Matrix slab W (W_ROWS, 128):
#   rows [0, EMB_PAD)           : packed embedding table [word; type; position]
#   per layer l (wb = W_BASE + l*W_PER_LAYER):
#     [wb      , wb+H)  cols [0, 3H) : Wqkv
#     [wb+H    , wb+2H) cols [0, H)  : Wo
#     [wb+2H   , wb+3H) cols [0,FFN) : W1
#     [wb+3H   , wb+3H+FFN) [0, H)   : W2
#   [HEAD_BASE, HEAD_BASE+H) cols [0,1) : predict head weight
EMB_ROWS = VOCAB + TYPE_VOCAB + MAX_POS        # 69
EMB_PAD = 72                                   # padded to a sublane multiple (extra rows are 0)
W_BASE = EMB_PAD
W_PER_LAYER = 3 * H + FFN                      # 160 rows per layer
HEAD_BASE = W_BASE + LAYERS * W_PER_LAYER
W_ROWS = HEAD_BASE + H                         # 424
W_COLS = 128

# Vector slab V (V_ROWS, 128): one (1, <=96) vector per row.
#   row 0: emb_ln_g, row 1: emb_ln_b
#   per layer l (vb = 2 + l*8): bqkv, bo, ln1_g, ln1_b, b1, b2, ln2_g, ln2_b
#   row HEAD_VROW: predict head bias
V_PER_LAYER = 8
HEAD_VROW = 2 + LAYERS * V_PER_LAYER
V_ROWS = HEAD_VROW + 1                         # 19
V_COLS = 128


# ----------------------------- kernel helpers ---------------------------------
def _layernorm(h, g, b):
    mu = jnp.mean(h, axis=-1, keepdims=True)
    d = h - mu
    var = jnp.mean(d * d, axis=-1, keepdims=True)
    return d * jax.lax.rsqrt(var + EPS) * g + b


def _gelu(y):
    # TODO(synk): HF BERT uses exact erf-GELU; tanh approximation used here.
    return 0.5 * y * (1.0 + jnp.tanh(0.7978845608028654 * (y + 0.044715 * y * y * y)))


# ----------------------------- fused forward kernel ---------------------------
def _cross_encoder_kernel(wid_ref, tid_ref, bias_ref, w_ref, v_ref, out_ref):
    f32 = jnp.float32

    # ---- embeddings: word + type + position via a single one-hot MXU matmul --
    col = jax.lax.broadcasted_iota(jnp.int32, (BS, EMB_PAD), 1)
    row = jax.lax.broadcasted_iota(jnp.int32, (BS, EMB_PAD), 0)
    onehot = ((col == wid_ref[...]).astype(f32)
              + (col == tid_ref[...] + VOCAB).astype(f32)
              + (col == (row & (S - 1)) + (VOCAB + TYPE_VOCAB)).astype(f32))
    x = jnp.dot(onehot, w_ref[0:EMB_PAD, 0:H], preferred_element_type=f32)    # (BS, H)

    # embedding LayerNorm (dropout is an eval no-op)
    x = _layernorm(x, v_ref[0:1, 0:H], v_ref[1:2, 0:H])

    bias = bias_ref[...]                                                      # (BS, BS)

    for l in range(LAYERS):
        wb = W_BASE + l * W_PER_LAYER
        vb = 2 + l * V_PER_LAYER

        # ---- multi-head self-attention: batches folded, QKV fused ------------
        qkv = (jnp.dot(x, w_ref[wb:wb + H, 0:3 * H], preferred_element_type=f32)
               + v_ref[vb:vb + 1, 0:3 * H])                                   # (BS, 3H)
        heads = []
        for h in range(NH):
            q = qkv[:, h * HD:(h + 1) * HD]
            k = qkv[:, H + h * HD:H + (h + 1) * HD]
            v = qkv[:, 2 * H + h * HD:2 * H + (h + 1) * HD]
            s = jax.lax.dot_general(q, k, (((1,), (1,)), ((), ())),
                                    preferred_element_type=f32) * ATTN_SCALE + bias
            m = jnp.max(s, axis=-1, keepdims=True)
            p = jnp.exp(s - m)
            p = p / jnp.sum(p, axis=-1, keepdims=True)                        # exact softmax
            heads.append(jnp.dot(p, v, preferred_element_type=f32))           # (BS, HD)
        ctx = jnp.concatenate(heads, axis=1)                                  # (BS, H)
        attn = (jnp.dot(ctx, w_ref[wb + H:wb + 2 * H, 0:H],
                        preferred_element_type=f32)
                + v_ref[vb + 1:vb + 2, 0:H])
        x = _layernorm(attn + x, v_ref[vb + 2:vb + 3, 0:H], v_ref[vb + 3:vb + 4, 0:H])

        # ---- feed-forward -----------------------------------------------------
        y = (jnp.dot(x, w_ref[wb + 2 * H:wb + 3 * H, 0:FFN],
                     preferred_element_type=f32)
             + v_ref[vb + 4:vb + 5, 0:FFN])
        y = _gelu(y)
        y = (jnp.dot(y, w_ref[wb + 3 * H:wb + 3 * H + FFN, 0:H],
                     preferred_element_type=f32)
             + v_ref[vb + 5:vb + 6, 0:H])
        x = _layernorm(y + x, v_ref[vb + 6:vb + 7, 0:H], v_ref[vb + 7:vb + 8, 0:H])

    # ---- CLS row select (tiny selection matmul) + predict head ----------------
    srow = jax.lax.broadcasted_iota(jnp.int32, (B, BS), 0)
    scol = jax.lax.broadcasted_iota(jnp.int32, (B, BS), 1)
    sel = (scol == srow * S).astype(f32)                                      # picks rows b*S
    h_cls = jnp.dot(sel, x, preferred_element_type=f32)                       # (B, H)
    logits = (jnp.dot(h_cls, w_ref[HEAD_BASE:HEAD_BASE + H, 0:1],
                      preferred_element_type=f32)
              + v_ref[HEAD_VROW:HEAD_VROW + 1, 0:1]) * T_SCALE
    out_ref[...] = logits


def _full_spec(a):
    n = a.ndim
    return pl.BlockSpec(a.shape, lambda i, _n=n: (0,) * _n)


# ----------------------------- forward (CrossEncoder.forward) -----------------
def cross_encoder_forward(params, input_ids, token_type_ids, attention_mask):
    wid = input_ids.reshape(BS, 1).astype(jnp.int32)
    tid = token_type_ids.reshape(BS, 1).astype(jnp.int32)

    # Additive attention bias folding BOTH the BERT padding mask ((1-m)*-1e4)
    # and the block-diagonal cross-batch mask (batches are folded into one
    # (BS, BS) score matrix inside the kernel). Masked entries underflow to
    # exactly 0 after softmax, so results match per-batch attention.
    pad = (1.0 - attention_mask.astype(jnp.float32)) * -10000.0               # (B, S)
    batch_ids = jnp.repeat(jnp.arange(B), S)                                  # (BS,)
    same_batch = batch_ids[:, None] == batch_ids[None, :]                     # (BS, BS)
    bias = jnp.where(same_batch,
                     jnp.broadcast_to(pad.reshape(1, BS), (BS, BS)),
                     -10000.0)

    args = (wid, tid, bias, params["w_slab"], params["v_slab"])
    return pl.pallas_call(
        _cross_encoder_kernel,
        grid=(1,),
        in_specs=[_full_spec(a) for a in args],
        out_specs=pl.BlockSpec((B, 1), lambda i: (0, 0)),
        out_shape=jax.ShapeDtypeStruct((B, 1), jnp.float32),
        compiler_params=pltpu.CompilerParams(dimension_semantics=("arbitrary",)),
    )(*args)


# ----------------------------- parameter init ---------------------------------
def init_params(key):
    def init(k, shape):
        return np.asarray(0.02 * jax.random.normal(k, shape, jnp.float32))

    keys = iter(jax.random.split(key, 4 + LAYERS * 6))

    w_slab = np.zeros((W_ROWS, W_COLS), np.float32)
    v_slab = np.zeros((V_ROWS, V_COLS), np.float32)

    # packed embedding table: [word ; token_type (expanded to 3) ; position]
    w_slab[0:VOCAB, 0:H] = init(next(keys), (VOCAB, H))
    w_slab[VOCAB:VOCAB + TYPE_VOCAB, 0:H] = init(next(keys), (TYPE_VOCAB, H))
    w_slab[VOCAB + TYPE_VOCAB:EMB_ROWS, 0:H] = init(next(keys), (MAX_POS, H))
    v_slab[0, 0:H] = 1.0                                    # embedding LN gamma (beta = 0)

    for l in range(LAYERS):
        wb = W_BASE + l * W_PER_LAYER
        vb = 2 + l * V_PER_LAYER
        w_slab[wb:wb + H, 0:H] = init(next(keys), (H, H))                  # Wq
        w_slab[wb:wb + H, H:2 * H] = init(next(keys), (H, H))              # Wk
        w_slab[wb:wb + H, 2 * H:3 * H] = init(next(keys), (H, H))          # Wv
        w_slab[wb + H:wb + 2 * H, 0:H] = init(next(keys), (H, H))          # Wo
        w_slab[wb + 2 * H:wb + 3 * H, 0:FFN] = init(next(keys), (H, FFN))  # W1
        w_slab[wb + 3 * H:wb + 3 * H + FFN, 0:H] = init(next(keys), (FFN, H))  # W2
        v_slab[vb + 2, 0:H] = 1.0                           # ln1 gamma
        v_slab[vb + 6, 0:H] = 1.0                           # ln2 gamma
        # all biases (bqkv, bo, b1, b2) and LN betas stay zero-initialized

    w_slab[HEAD_BASE:HEAD_BASE + H, 0:1] = init(next(keys), (H, 1))        # predict head
    # predict head bias at v_slab[HEAD_VROW, 0] stays zero

    return {"w_slab": jnp.asarray(w_slab), "v_slab": jnp.asarray(v_slab)}


# ----------------------------- main --------------------------------------------
if __name__ == "__main__":
    key = jax.random.PRNGKey(0)
    k_param, k_ids, k_type = jax.random.split(key, 3)

    params = init_params(k_param)

    input_ids = jax.random.randint(k_ids, (B, S), 0, VOCAB, dtype=jnp.int32)
    token_type_ids = jax.random.randint(k_type, (B, S), 0, TYPE_VOCAB, dtype=jnp.int32)
    attention_mask = jnp.ones((B, S), jnp.int32).at[1, S - 2:].set(0)      # pad tail of batch 1

    fwd = jax.jit(cross_encoder_forward)
    logits = fwd(params, input_ids, token_type_ids, attention_mask)
    jax.block_until_ready(logits)

    assert logits.shape == (B, 1) and bool(jnp.all(jnp.isfinite(logits)))
    print("KERNEL_OK")
</pallas_src>

<mosaic_0001>
module attributes {stable_mosaic.version = 11 : i64} {
  func.func @_cross_encoder_kernel(%arg0: i32, %arg1: memref<16x1xi32, #tpu.memory_space<vmem>>, %arg2: memref<16x1xi32, #tpu.memory_space<vmem>>, %arg3: memref<16x16xf32, #tpu.memory_space<vmem>>, %arg4: memref<424x128xf32, #tpu.memory_space<vmem>>, %arg5: memref<19x128xf32, #tpu.memory_space<vmem>>, %arg6: memref<2x1xf32, #tpu.memory_space<vmem>>) attributes {dimension_semantics = [#tpu.dimension_semantics<arbitrary>], iteration_bounds = array<i64: 1>, scalar_prefetch = 0 : i64, scratch_operands = 0 : i64, tpu.core_type = #tpu.core_type<tc>, window_params = [{pipeline_mode = #tpu.pipeline_mode<synchronous>, transform_indices = @transform_0, window_bounds = array<i64: 16, 1>}, {pipeline_mode = #tpu.pipeline_mode<synchronous>, transform_indices = @transform_1, window_bounds = array<i64: 16, 1>}, {pipeline_mode = #tpu.pipeline_mode<synchronous>, transform_indices = @transform_2, window_bounds = array<i64: 16, 16>}, {pipeline_mode = #tpu.pipeline_mode<synchronous>, transform_indices = @transform_3, window_bounds = array<i64: 424, 128>}, {pipeline_mode = #tpu.pipeline_mode<synchronous>, transform_indices = @transform_4, window_bounds = array<i64: 19, 128>}, {pipeline_mode = #tpu.pipeline_mode<synchronous>, transform_indices = @transform_5, window_bounds = array<i64: 2, 1>}]} {
    %0 = tpu.iota {dimensions = array<i32: 1>} : vector<16x72xi32>
    %1 = tpu.iota {dimensions = array<i32: 0>} : vector<16x72xi32>
    %c0 = arith.constant 0 : index
    %c0_0 = arith.constant 0 : index
    %2 = vector.load %arg1[%c0, %c0_0] : memref<16x1xi32, #tpu.memory_space<vmem>>, vector<16x1xi32>
    %3 = vector.broadcast %2 : vector<16x1xi32> to vector<16x72xi32>
    %4 = arith.cmpi eq, %0, %3 : vector<16x72xi32>
    %5 = arith.extui %4 : vector<16x72xi1> to vector<16x72xi32>
    %6 = arith.sitofp %5 : vector<16x72xi32> to vector<16x72xf32>
    %c0_1 = arith.constant 0 : index
    %c0_2 = arith.constant 0 : index
    %7 = vector.load %arg2[%c0_1, %c0_2] : memref<16x1xi32, #tpu.memory_space<vmem>>, vector<16x1xi32>
    %c50_i32 = arith.constant 50 : i32
    %8 = vector.broadcast %c50_i32 : i32 to vector<16x1xi32>
    %9 = arith.addi %7, %8 : vector<16x1xi32>
    %10 = vector.broadcast %9 : vector<16x1xi32> to vector<16x72xi32>
    %11 = arith.cmpi eq, %0, %10 : vector<16x72xi32>
    %12 = arith.extui %11 : vector<16x72xi1> to vector<16x72xi32>
    %13 = arith.sitofp %12 : vector<16x72xi32> to vector<16x72xf32>
    %14 = arith.addf %6, %13 : vector<16x72xf32>
    %c7_i32 = arith.constant 7 : i32
    %15 = vector.broadcast %c7_i32 : i32 to vector<16x72xi32>
    %16 = arith.andi %1, %15 : vector<16x72xi32>
    %c53_i32 = arith.constant 53 : i32
    %17 = vector.broadcast %c53_i32 : i32 to vector<16x72xi32>
    %18 = arith.addi %16, %17 : vector<16x72xi32>
    %19 = arith.cmpi eq, %0, %18 : vector<16x72xi32>
    %20 = arith.extui %19 : vector<16x72xi1> to vector<16x72xi32>
    %21 = arith.sitofp %20 : vector<16x72xi32> to vector<16x72xf32>
    %22 = arith.addf %14, %21 : vector<16x72xf32>
    %c0_3 = arith.constant 0 : index
    %c0_4 = arith.constant 0 : index
    %23 = vector.load %arg4[%c0_3, %c0_4] : memref<424x128xf32, #tpu.memory_space<vmem>>, vector<72x32xf32>
    %cst = arith.constant dense<0.000000e+00> : vector<16x32xf32>
    %24 = tpu.matmul %22, %23, %cst {dimension_numbers = #tpu.dot_dimension_numbers<[1], [0], [0], [1], [0, 0, 1, 1], [], []>} : vector<16x72xf32>, vector<72x32xf32>, vector<16x32xf32> -> vector<16x32xf32>
    %c0_5 = arith.constant 0 : index
    %c0_6 = arith.constant 0 : index
    %25 = vector.load %arg5[%c0_5, %c0_6] : memref<19x128xf32, #tpu.memory_space<vmem>>, vector<1x32xf32>
    %c1 = arith.constant 1 : index
    %c0_7 = arith.constant 0 : index
    %26 = vector.load %arg5[%c1, %c0_7] : memref<19x128xf32, #tpu.memory_space<vmem>>, vector<1x32xf32>
    %cst_8 = arith.constant dense<0.000000e+00> : vector<16xf32>
    %27 = vector.multi_reduction <add>, %24, %cst_8 [1] : vector<16x32xf32> to vector<16xf32>
    %28 = vector.shape_cast %27 : vector<16xf32> to vector<16x1xf32>
    %cst_9 = arith.constant 3.200000e+01 : f32
    %29 = vector.broadcast %cst_9 : f32 to vector<16x1xf32>
    %30 = arith.divf %28, %29 : vector<16x1xf32>
    %31 = vector.broadcast %30 : vector<16x1xf32> to vector<16x32xf32>
    %32 = arith.subf %24, %31 : vector<16x32xf32>
    %33 = arith.mulf %32, %32 : vector<16x32xf32>
    %cst_10 = arith.constant dense<0.000000e+00> : vector<16xf32>
    %34 = vector.multi_reduction <add>, %33, %cst_10 [1] : vector<16x32xf32> to vector<16xf32>
    %35 = vector.shape_cast %34 : vector<16xf32> to vector<16x1xf32>
    %cst_11 = arith.constant 3.200000e+01 : f32
    %36 = vector.broadcast %cst_11 : f32 to vector<16x1xf32>
    %37 = arith.divf %35, %36 : vector<16x1xf32>
    %cst_12 = arith.constant 9.99999996E-13 : f32
    %38 = vector.broadcast %cst_12 : f32 to vector<16x1xf32>
    %39 = arith.addf %37, %38 : vector<16x1xf32>
    %40 = math.rsqrt %39 : vector<16x1xf32>
    %41 = vector.broadcast %40 : vector<16x1xf32> to vector<16x32xf32>
    %42 = arith.mulf %32, %41 : vector<16x32xf32>
    %43 = vector.broadcast %25 : vector<1x32xf32> to vector<16x32xf32>
    %44 = arith.mulf %42, %43 : vector<16x32xf32>
    %45 = vector.broadcast %26 : vector<1x32xf32> to vector<16x32xf32>
    %46 = arith.addf %44, %45 : vector<16x32xf32>
    %c0_13 = arith.constant 0 : index
    %c0_14 = arith.constant 0 : index
    %47 = vector.load %arg3[%c0_13, %c0_14] : memref<16x16xf32, #tpu.memory_space<vmem>>, vector<16x16xf32>
    %c72 = arith.constant 72 : index
    %c0_15 = arith.constant 0 : index
    %48 = vector.load %arg4[%c72, %c0_15] : memref<424x128xf32, #tpu.memory_space<vmem>>, vector<32x96xf32>
    %cst_16 = arith.constant dense<0.000000e+00> : vector<16x96xf32>
    %49 = tpu.matmul %46, %48, %cst_16 {dimension_numbers = #tpu.dot_dimension_numbers<[1], [0], [0], [1], [0, 0, 1, 1], [], []>} : vector<16x32xf32>, vector<32x96xf32>, vector<16x96xf32> -> vector<16x96xf32>
    %c2 = arith.constant 2 : index
    %c0_17 = arith.constant 0 : index
    %50 = vector.load %arg5[%c2, %c0_17] : memref<19x128xf32, #tpu.memory_space<vmem>>, vector<1x96xf32>
    %51 = vector.broadcast %50 : vector<1x96xf32> to vector<16x96xf32>
    %52 = arith.addf %49, %51 : vector<16x96xf32>
    %53 = vector.extract_strided_slice %52 {offsets = [0, 0], sizes = [16, 16], strides = [1, 1]} : vector<16x96xf32> to vector<16x16xf32>
    %54 = vector.extract_strided_slice %52 {offsets = [0, 32], sizes = [16, 16], strides = [1, 1]} : vector<16x96xf32> to vector<16x16xf32>
    %55 = vector.extract_strided_slice %52 {offsets = [0, 64], sizes = [16, 16], strides = [1, 1]} : vector<16x96xf32> to vector<16x16xf32>
    %cst_18 = arith.constant dense<0.000000e+00> : vector<16x16xf32>
    %56 = tpu.matmul %53, %54, %cst_18 {dimension_numbers = #tpu.dot_dimension_numbers<[1], [1], [0], [0], [0, 0, 1, 0], [], []>} : vector<16x16xf32>, vector<16x16xf32>, vector<16x16xf32> -> vector<16x16xf32>
    %cst_19 = arith.constant 2.500000e-01 : f32
    %57 = vector.broadcast %cst_19 : f32 to vector<16x16xf32>
    %58 = arith.mulf %56, %57 : vector<16x16xf32>
    %59 = arith.addf %58, %47 : vector<16x16xf32>
    %cst_20 = arith.constant dense<0xFF800000> : vector<16xf32>
    %60 = vector.multi_reduction <maximumf>, %59, %cst_20 [1] : vector<16x16xf32> to vector<16xf32>
    %61 = vector.shape_cast %60 : vector<16xf32> to vector<16x1xf32>
    %62 = vector.broadcast %61 : vector<16x1xf32> to vector<16x16xf32>
    %63 = arith.subf %59, %62 : vector<16x16xf32>
    %64 = math.exp %63 : vector<16x16xf32>
    %cst_21 = arith.constant dense<0.000000e+00> : vector<16xf32>
    %65 = vector.multi_reduction <add>, %64, %cst_21 [1] : vector<16x16xf32> to vector<16xf32>
    %66 = vector.shape_cast %65 : vector<16xf32> to vector<16x1xf32>
    %67 = vector.broadcast %66 : vector<16x1xf32> to vector<16x16xf32>
    %68 = arith.divf %64, %67 : vector<16x16xf32>
    %cst_22 = arith.constant dense<0.000000e+00> : vector<16x16xf32>
    %69 = tpu.matmul %68, %55, %cst_22 {dimension_numbers = #tpu.dot_dimension_numbers<[1], [0], [0], [1], [0, 0, 1, 1], [], []>} : vector<16x16xf32>, vector<16x16xf32>, vector<16x16xf32> -> vector<16x16xf32>
    %70 = vector.extract_strided_slice %52 {offsets = [0, 16], sizes = [16, 16], strides = [1, 1]} : vector<16x96xf32> to vector<16x16xf32>
    %71 = vector.extract_strided_slice %52 {offsets = [0, 48], sizes = [16, 16], strides = [1, 1]} : vector<16x96xf32> to vector<16x16xf32>
    %72 = vector.extract_strided_slice %52 {offsets = [0, 80], sizes = [16, 16], strides = [1, 1]} : vector<16x96xf32> to vector<16x16xf32>
    %cst_23 = arith.constant dense<0.000000e+00> : vector<16x16xf32>
    %73 = tpu.matmul %70, %71, %cst_23 {dimension_numbers = #tpu.dot_dimension_numbers<[1], [1], [0], [0], [0, 0, 1, 0], [], []>} : vector<16x16xf32>, vector<16x16xf32>, vector<16x16xf32> -> vector<16x16xf32>
    %cst_24 = arith.constant 2.500000e-01 : f32
    %74 = vector.broadcast %cst_24 : f32 to vector<16x16xf32>
    %75 = arith.mulf %73, %74 : vector<16x16xf32>
    %76 = arith.addf %75, %47 : vector<16x16xf32>
    %cst_25 = arith.constant dense<0xFF800000> : vector<16xf32>
    %77 = vector.multi_reduction <maximumf>, %76, %cst_25 [1] : vector<16x16xf32> to vector<16xf32>
    %78 = vector.shape_cast %77 : vector<16xf32> to vector<16x1xf32>
    %79 = vector.broadcast %78 : vector<16x1xf32> to vector<16x16xf32>
    %80 = arith.subf %76, %79 : vector<16x16xf32>
    %81 = math.exp %80 : vector<16x16xf32>
    %cst_26 = arith.constant dense<0.000000e+00> : vector<16xf32>
    %82 = vector.multi_reduction <add>, %81, %cst_26 [1] : vector<16x16xf32> to vector<16xf32>
    %83 = vector.shape_cast %82 : vector<16xf32> to vector<16x1xf32>
    %84 = vector.broadcast %83 : vector<16x1xf32> to vector<16x16xf32>
    %85 = arith.divf %81, %84 : vector<16x16xf32>
    %cst_27 = arith.constant dense<0.000000e+00> : vector<16x16xf32>
    %86 = tpu.matmul %85, %72, %cst_27 {dimension_numbers = #tpu.dot_dimension_numbers<[1], [0], [0], [1], [0, 0, 1, 1], [], []>} : vector<16x16xf32>, vector<16x16xf32>, vector<16x16xf32> -> vector<16x16xf32>
    %87 = tpu.concatenate %69, %86 in 1 : vector<16x16xf32>, vector<16x16xf32> -> vector<16x32xf32>
    %c104 = arith.constant 104 : index
    %c0_28 = arith.constant 0 : index
    %88 = vector.load %arg4[%c104, %c0_28] : memref<424x128xf32, #tpu.memory_space<vmem>>, vector<32x32xf32>
    %cst_29 = arith.constant dense<0.000000e+00> : vector<16x32xf32>
    %89 = tpu.matmul %87, %88, %cst_29 {dimension_numbers = #tpu.dot_dimension_numbers<[1], [0], [0], [1], [0, 0, 1, 1], [], []>} : vector<16x32xf32>, vector<32x32xf32>, vector<16x32xf32> -> vector<16x32xf32>
    %c3 = arith.constant 3 : index
    %c0_30 = arith.constant 0 : index
    %90 = vector.load %arg5[%c3, %c0_30] : memref<19x128xf32, #tpu.memory_space<vmem>>, vector<1x32xf32>
    %91 = vector.broadcast %90 : vector<1x32xf32> to vector<16x32xf32>
    %92 = arith.addf %89, %91 : vector<16x32xf32>
    %93 = arith.addf %92, %46 : vector<16x32xf32>
    %c4 = arith.constant 4 : index
    %c0_31 = arith.constant 0 : index
    %94 = vector.load %arg5[%c4, %c0_31] : memref<19x128xf32, #tpu.memory_space<vmem>>, vector<1x32xf32>
    %c5 = arith.constant 5 : index
    %c0_32 = arith.constant 0 : index
    %95 = vector.load %arg5[%c5, %c0_32] : memref<19x128xf32, #tpu.memory_space<vmem>>, vector<1x32xf32>
    %cst_33 = arith.constant dense<0.000000e+00> : vector<16xf32>
    %96 = vector.multi_reduction <add>, %93, %cst_33 [1] : vector<16x32xf32> to vector<16xf32>
    %97 = vector.shape_cast %96 : vector<16xf32> to vector<16x1xf32>
    %cst_34 = arith.constant 3.200000e+01 : f32
    %98 = vector.broadcast %cst_34 : f32 to vector<16x1xf32>
    %99 = arith.divf %97, %98 : vector<16x1xf32>
    %100 = vector.broadcast %99 : vector<16x1xf32> to vector<16x32xf32>
    %101 = arith.subf %93, %100 : vector<16x32xf32>
    %102 = arith.mulf %101, %101 : vector<16x32xf32>
    %cst_35 = arith.constant dense<0.000000e+00> : vector<16xf32>
    %103 = vector.multi_reduction <add>, %102, %cst_35 [1] : vector<16x32xf32> to vector<16xf32>
    %104 = vector.shape_cast %103 : vector<16xf32> to vector<16x1xf32>
    %cst_36 = arith.constant 3.200000e+01 : f32
    %105 = vector.broadcast %cst_36 : f32 to vector<16x1xf32>
    %106 = arith.divf %104, %105 : vector<16x1xf32>
    %cst_37 = arith.constant 9.99999996E-13 : f32
    %107 = vector.broadcast %cst_37 : f32 to vector<16x1xf32>
    %108 = arith.addf %106, %107 : vector<16x1xf32>
    %109 = math.rsqrt %108 : vector<16x1xf32>
    %110 = vector.broadcast %109 : vector<16x1xf32> to vector<16x32xf32>
    %111 = arith.mulf %101, %110 : vector<16x32xf32>
    %112 = vector.broadcast %94 : vector<1x32xf32> to vector<16x32xf32>
    %113 = arith.mulf %111, %112 : vector<16x32xf32>
    %114 = vector.broadcast %95 : vector<1x32xf32> to vector<16x32xf32>
    %115 = arith.addf %113, %114 : vector<16x32xf32>
    %c136 = arith.constant 136 : index
    %c0_38 = arith.constant 0 : index
    %116 = vector.load %arg4[%c136, %c0_38] : memref<424x128xf32, #tpu.memory_space<vmem>>, vector<32x64xf32>
    %cst_39 = arith.constant dense<0.000000e+00> : vector<16x64xf32>
    %117 = tpu.matmul %115, %116, %cst_39 {dimension_numbers = #tpu.dot_dimension_numbers<[1], [0], [0], [1], [0, 0, 1, 1], [], []>} : vector<16x32xf32>, vector<32x64xf32>, vector<16x64xf32> -> vector<16x64xf32>
    %c6 = arith.constant 6 : index
    %c0_40 = arith.constant 0 : index
    %118 = vector.load %arg5[%c6, %c0_40] : memref<19x128xf32, #tpu.memory_space<vmem>>, vector<1x64xf32>
    %119 = vector.broadcast %118 : vector<1x64xf32> to vector<16x64xf32>
    %120 = arith.addf %117, %119 : vector<16x64xf32>
    %cst_41 = arith.constant 5.000000e-01 : f32
    %121 = vector.broadcast %cst_41 : f32 to vector<16x64xf32>
    %122 = arith.mulf %121, %120 : vector<16x64xf32>
    %cst_42 = arith.constant 4.471500e-02 : f32
    %123 = vector.broadcast %cst_42 : f32 to vector<16x64xf32>
    %124 = arith.mulf %123, %120 : vector<16x64xf32>
    %125 = arith.mulf %124, %120 : vector<16x64xf32>
    %126 = arith.mulf %125, %120 : vector<16x64xf32>
    %127 = arith.addf %120, %126 : vector<16x64xf32>
    %cst_43 = arith.constant 0.797884583 : f32
    %128 = vector.broadcast %cst_43 : f32 to vector<16x64xf32>
    %129 = arith.mulf %128, %127 : vector<16x64xf32>
    %130 = math.tanh %129 : vector<16x64xf32>
    %cst_44 = arith.constant 1.000000e+00 : f32
    %131 = vector.broadcast %cst_44 : f32 to vector<16x64xf32>
    %132 = arith.addf %131, %130 : vector<16x64xf32>
    %133 = arith.mulf %122, %132 : vector<16x64xf32>
    %c168 = arith.constant 168 : index
    %c0_45 = arith.constant 0 : index
    %134 = vector.load %arg4[%c168, %c0_45] : memref<424x128xf32, #tpu.memory_space<vmem>>, vector<64x32xf32>
    %cst_46 = arith.constant dense<0.000000e+00> : vector<16x32xf32>
    %135 = tpu.matmul %133, %134, %cst_46 {dimension_numbers = #tpu.dot_dimension_numbers<[1], [0], [0], [1], [0, 0, 1, 1], [], []>} : vector<16x64xf32>, vector<64x32xf32>, vector<16x32xf32> -> vector<16x32xf32>
    %c7 = arith.constant 7 : index
    %c0_47 = arith.constant 0 : index
    %136 = vector.load %arg5[%c7, %c0_47] : memref<19x128xf32, #tpu.memory_space<vmem>>, vector<1x32xf32>
    %137 = vector.broadcast %136 : vector<1x32xf32> to vector<16x32xf32>
    %138 = arith.addf %135, %137 : vector<16x32xf32>
    %139 = arith.addf %138, %115 : vector<16x32xf32>
    %c8 = arith.constant 8 : index
    %c0_48 = arith.constant 0 : index
    %140 = vector.load %arg5[%c8, %c0_48] : memref<19x128xf32, #tpu.memory_space<vmem>>, vector<1x32xf32>
    %c9 = arith.constant 9 : index
    %c0_49 = arith.constant 0 : index
    %141 = vector.load %arg5[%c9, %c0_49] : memref<19x128xf32, #tpu.memory_space<vmem>>, vector<1x32xf32>
    %cst_50 = arith.constant dense<0.000000e+00> : vector<16xf32>
    %142 = vector.multi_reduction <add>, %139, %cst_50 [1] : vector<16x32xf32> to vector<16xf32>
    %143 = vector.shape_cast %142 : vector<16xf32> to vector<16x1xf32>
    %cst_51 = arith.constant 3.200000e+01 : f32
    %144 = vector.broadcast %cst_51 : f32 to vector<16x1xf32>
    %145 = arith.divf %143, %144 : vector<16x1xf32>
    %146 = vector.broadcast %145 : vector<16x1xf32> to vector<16x32xf32>
    %147 = arith.subf %139, %146 : vector<16x32xf32>
    %148 = arith.mulf %147, %147 : vector<16x32xf32>
    %cst_52 = arith.constant dense<0.000000e+00> : vector<16xf32>
    %149 = vector.multi_reduction <add>, %148, %cst_52 [1] : vector<16x32xf32> to vector<16xf32>
    %150 = vector.shape_cast %149 : vector<16xf32> to vector<16x1xf32>
    %cst_53 = arith.constant 3.200000e+01 : f32
    %151 = vector.broadcast %cst_53 : f32 to vector<16x1xf32>
    %152 = arith.divf %150, %151 : vector<16x1xf32>
    %cst_54 = arith.constant 9.99999996E-13 : f32
    %153 = vector.broadcast %cst_54 : f32 to vector<16x1xf32>
    %154 = arith.addf %152, %153 : vector<16x1xf32>
    %155 = math.rsqrt %154 : vector<16x1xf32>
    %156 = vector.broadcast %155 : vector<16x1xf32> to vector<16x32xf32>
    %157 = arith.mulf %147, %156 : vector<16x32xf32>
    %158 = vector.broadcast %140 : vector<1x32xf32> to vector<16x32xf32>
    %159 = arith.mulf %157, %158 : vector<16x32xf32>
    %160 = vector.broadcast %141 : vector<1x32xf32> to vector<16x32xf32>
    %161 = arith.addf %159, %160 : vector<16x32xf32>
    %c232 = arith.constant 232 : index
    %c0_55 = arith.constant 0 : index
    %162 = vector.load %arg4[%c232, %c0_55] : memref<424x128xf32, #tpu.memory_space<vmem>>, vector<32x96xf32>
    %cst_56 = arith.constant dense<0.000000e+00> : vector<16x96xf32>
    %163 = tpu.matmul %161, %162, %cst_56 {dimension_numbers = #tpu.dot_dimension_numbers<[1], [0], [0], [1], [0, 0, 1, 1], [], []>} : vector<16x32xf32>, vector<32x96xf32>, vector<16x96xf32> -> vector<16x96xf32>
    %c10 = arith.constant 10 : index
    %c0_57 = arith.constant 0 : index
    %164 = vector.load %arg5[%c10, %c0_57] : memref<19x128xf32, #tpu.memory_space<vmem>>, vector<1x96xf32>
    %165 = vector.broadcast %164 : vector<1x96xf32> to vector<16x96xf32>
    %166 = arith.addf %163, %165 : vector<16x96xf32>
    %167 = vector.extract_strided_slice %166 {offsets = [0, 0], sizes = [16, 16], strides = [1, 1]} : vector<16x96xf32> to vector<16x16xf32>
    %168 = vector.extract_strided_slice %166 {offsets = [0, 32], sizes = [16, 16], strides = [1, 1]} : vector<16x96xf32> to vector<16x16xf32>
    %169 = vector.extract_strided_slice %166 {offsets = [0, 64], sizes = [16, 16], strides = [1, 1]} : vector<16x96xf32> to vector<16x16xf32>
    %cst_58 = arith.constant dense<0.000000e+00> : vector<16x16xf32>
    %170 = tpu.matmul %167, %168, %cst_58 {dimension_numbers = #tpu.dot_dimension_numbers<[1], [1], [0], [0], [0, 0, 1, 0], [], []>} : vector<16x16xf32>, vector<16x16xf32>, vector<16x16xf32> -> vector<16x16xf32>
    %cst_59 = arith.constant 2.500000e-01 : f32
    %171 = vector.broadcast %cst_59 : f32 to vector<16x16xf32>
    %172 = arith.mulf %170, %171 : vector<16x16xf32>
    %173 = arith.addf %172, %47 : vector<16x16xf32>
    %cst_60 = arith.constant dense<0xFF800000> : vector<16xf32>
    %174 = vector.multi_reduction <maximumf>, %173, %cst_60 [1] : vector<16x16xf32> to vector<16xf32>
    %175 = vector.shape_cast %174 : vector<16xf32> to vector<16x1xf32>
    %176 = vector.broadcast %175 : vector<16x1xf32> to vector<16x16xf32>
    %177 = arith.subf %173, %176 : vector<16x16xf32>
    %178 = math.exp %177 : vector<16x16xf32>
    %cst_61 = arith.constant dense<0.000000e+00> : vector<16xf32>
    %179 = vector.multi_reduction <add>, %178, %cst_61 [1] : vector<16x16xf32> to vector<16xf32>
    %180 = vector.shape_cast %179 : vector<16xf32> to vector<16x1xf32>
    %181 = vector.broadcast %180 : vector<16x1xf32> to vector<16x16xf32>
    %182 = arith.divf %178, %181 : vector<16x16xf32>
    %cst_62 = arith.constant dense<0.000000e+00> : vector<16x16xf32>
    %183 = tpu.matmul %182, %169, %cst_62 {dimension_numbers = #tpu.dot_dimension_numbers<[1], [0], [0], [1], [0, 0, 1, 1], [], []>} : vector<16x16xf32>, vector<16x16xf32>, vector<16x16xf32> -> vector<16x16xf32>
    %184 = vector.extract_strided_slice %166 {offsets = [0, 16], sizes = [16, 16], strides = [1, 1]} : vector<16x96xf32> to vector<16x16xf32>
    %185 = vector.extract_strided_slice %166 {offsets = [0, 48], sizes = [16, 16], strides = [1, 1]} : vector<16x96xf32> to vector<16x16xf32>
    %186 = vector.extract_strided_slice %166 {offsets = [0, 80], sizes = [16, 16], strides = [1, 1]} : vector<16x96xf32> to vector<16x16xf32>
    %cst_63 = arith.constant dense<0.000000e+00> : vector<16x16xf32>
    %187 = tpu.matmul %184, %185, %cst_63 {dimension_numbers = #tpu.dot_dimension_numbers<[1], [1], [0], [0], [0, 0, 1, 0], [], []>} : vector<16x16xf32>, vector<16x16xf32>, vector<16x16xf32> -> vector<16x16xf32>
    %cst_64 = arith.constant 2.500000e-01 : f32
    %188 = vector.broadcast %cst_64 : f32 to vector<16x16xf32>
    %189 = arith.mulf %187, %188 : vector<16x16xf32>
    %190 = arith.addf %189, %47 : vector<16x16xf32>
    %cst_65 = arith.constant dense<0xFF800000> : vector<16xf32>
    %191 = vector.multi_reduction <maximumf>, %190, %cst_65 [1] : vector<16x16xf32> to vector<16xf32>
    %192 = vector.shape_cast %191 : vector<16xf32> to vector<16x1xf32>
    %193 = vector.broadcast %192 : vector<16x1xf32> to vector<16x16xf32>
    %194 = arith.subf %190, %193 : vector<16x16xf32>
    %195 = math.exp %194 : vector<16x16xf32>
    %cst_66 = arith.constant dense<0.000000e+00> : vector<16xf32>
    %196 = vector.multi_reduction <add>, %195, %cst_66 [1] : vector<16x16xf32> to vector<16xf32>
    %197 = vector.shape_cast %196 : vector<16xf32> to vector<16x1xf32>
    %198 = vector.broadcast %197 : vector<16x1xf32> to vector<16x16xf32>
    %199 = arith.divf %195, %198 : vector<16x16xf32>
    %cst_67 = arith.constant dense<0.000000e+00> : vector<16x16xf32>
    %200 = tpu.matmul %199, %186, %cst_67 {dimension_numbers = #tpu.dot_dimension_numbers<[1], [0], [0], [1], [0, 0, 1, 1], [], []>} : vector<16x16xf32>, vector<16x16xf32>, vector<16x16xf32> -> vector<16x16xf32>
    %201 = tpu.concatenate %183, %200 in 1 : vector<16x16xf32>, vector<16x16xf32> -> vector<16x32xf32>
    %c264 = arith.constant 264 : index
    %c0_68 = arith.constant 0 : index
    %202 = vector.load %arg4[%c264, %c0_68] : memref<424x128xf32, #tpu.memory_space<vmem>>, vector<32x32xf32>
    %cst_69 = arith.constant dense<0.000000e+00> : vector<16x32xf32>
    %203 = tpu.matmul %201, %202, %cst_69 {dimension_numbers = #tpu.dot_dimension_numbers<[1], [0], [0], [1], [0, 0, 1, 1], [], []>} : vector<16x32xf32>, vector<32x32xf32>, vector<16x32xf32> -> vector<16x32xf32>
    %c11 = arith.constant 11 : index
    %c0_70 = arith.constant 0 : index
    %204 = vector.load %arg5[%c11, %c0_70] : memref<19x128xf32, #tpu.memory_space<vmem>>, vector<1x32xf32>
    %205 = vector.broadcast %204 : vector<1x32xf32> to vector<16x32xf32>
    %206 = arith.addf %203, %205 : vector<16x32xf32>
    %207 = arith.addf %206, %161 : vector<16x32xf32>
    %c12 = arith.constant 12 : index
    %c0_71 = arith.constant 0 : index
    %208 = vector.load %arg5[%c12, %c0_71] : memref<19x128xf32, #tpu.memory_space<vmem>>, vector<1x32xf32>
    %c13 = arith.constant 13 : index
    %c0_72 = arith.constant 0 : index
    %209 = vector.load %arg5[%c13, %c0_72] : memref<19x128xf32, #tpu.memory_space<vmem>>, vector<1x32xf32>
    %cst_73 = arith.constant dense<0.000000e+00> : vector<16xf32>
    %210 = vector.multi_reduction <add>, %207, %cst_73 [1] : vector<16x32xf32> to vector<16xf32>
    %211 = vector.shape_cast %210 : vector<16xf32> to vector<16x1xf32>
    %cst_74 = arith.constant 3.200000e+01 : f32
    %212 = vector.broadcast %cst_74 : f32 to vector<16x1xf32>
    %213 = arith.divf %211, %212 : vector<16x1xf32>
    %214 = vector.broadcast %213 : vector<16x1xf32> to vector<16x32xf32>
    %215 = arith.subf %207, %214 : vector<16x32xf32>
    %216 = arith.mulf %215, %215 : vector<16x32xf32>
    %cst_75 = arith.constant dense<0.000000e+00> : vector<16xf32>
    %217 = vector.multi_reduction <add>, %216, %cst_75 [1] : vector<16x32xf32> to vector<16xf32>
    %218 = vector.shape_cast %217 : vector<16xf32> to vector<16x1xf32>
    %cst_76 = arith.constant 3.200000e+01 : f32
    %219 = vector.broadcast %cst_76 : f32 to vector<16x1xf32>
    %220 = arith.divf %218, %219 : vector<16x1xf32>
    %cst_77 = arith.constant 9.99999996E-13 : f32
    %221 = vector.broadcast %cst_77 : f32 to vector<16x1xf32>
    %222 = arith.addf %220, %221 : vector<16x1xf32>
    %223 = math.rsqrt %222 : vector<16x1xf32>
    %224 = vector.broadcast %223 : vector<16x1xf32> to vector<16x32xf32>
    %225 = arith.mulf %215, %224 : vector<16x32xf32>
    %226 = vector.broadcast %208 : vector<1x32xf32> to vector<16x32xf32>
    %227 = arith.mulf %225, %226 : vector<16x32xf32>
    %228 = vector.broadcast %209 : vector<1x32xf32> to vector<16x32xf32>
    %229 = arith.addf %227, %228 : vector<16x32xf32>
    %c296 = arith.constant 296 : index
    %c0_78 = arith.constant 0 : index
    %230 = vector.load %arg4[%c296, %c0_78] : memref<424x128xf32, #tpu.memory_space<vmem>>, vector<32x64xf32>
    %cst_79 = arith.constant dense<0.000000e+00> : vector<16x64xf32>
    %231 = tpu.matmul %229, %230, %cst_79 {dimension_numbers = #tpu.dot_dimension_numbers<[1], [0], [0], [1], [0, 0, 1, 1], [], []>} : vector<16x32xf32>, vector<32x64xf32>, vector<16x64xf32> -> vector<16x64xf32>
    %c14 = arith.constant 14 : index
    %c0_80 = arith.constant 0 : index
    %232 = vector.load %arg5[%c14, %c0_80] : memref<19x128xf32, #tpu.memory_space<vmem>>, vector<1x64xf32>
    %233 = vector.broadcast %232 : vector<1x64xf32> to vector<16x64xf32>
    %234 = arith.addf %231, %233 : vector<16x64xf32>
    %cst_81 = arith.constant 5.000000e-01 : f32
    %235 = vector.broadcast %cst_81 : f32 to vector<16x64xf32>
    %236 = arith.mulf %235, %234 : vector<16x64xf32>
    %cst_82 = arith.constant 4.471500e-02 : f32
    %237 = vector.broadcast %cst_82 : f32 to vector<16x64xf32>
    %238 = arith.mulf %237, %234 : vector<16x64xf32>
    %239 = arith.mulf %238, %234 : vector<16x64xf32>
    %240 = arith.mulf %239, %234 : vector<16x64xf32>
    %241 = arith.addf %234, %240 : vector<16x64xf32>
    %cst_83 = arith.constant 0.797884583 : f32
    %242 = vector.broadcast %cst_83 : f32 to vector<16x64xf32>
    %243 = arith.mulf %242, %241 : vector<16x64xf32>
    %244 = math.tanh %243 : vector<16x64xf32>
    %cst_84 = arith.constant 1.000000e+00 : f32
    %245 = vector.broadcast %cst_84 : f32 to vector<16x64xf32>
    %246 = arith.addf %245, %244 : vector<16x64xf32>
    %247 = arith.mulf %236, %246 : vector<16x64xf32>
    %c328 = arith.constant 328 : index
    %c0_85 = arith.constant 0 : index
    %248 = vector.load %arg4[%c328, %c0_85] : memref<424x128xf32, #tpu.memory_space<vmem>>, vector<64x32xf32>
    %cst_86 = arith.constant dense<0.000000e+00> : vector<16x32xf32>
    %249 = tpu.matmul %247, %248, %cst_86 {dimension_numbers = #tpu.dot_dimension_numbers<[1], [0], [0], [1], [0, 0, 1, 1], [], []>} : vector<16x64xf32>, vector<64x32xf32>, vector<16x32xf32> -> vector<16x32xf32>
    %c15 = arith.constant 15 : index
    %c0_87 = arith.constant 0 : index
    %250 = vector.load %arg5[%c15, %c0_87] : memref<19x128xf32, #tpu.memory_space<vmem>>, vector<1x32xf32>
    %251 = vector.broadcast %250 : vector<1x32xf32> to vector<16x32xf32>
    %252 = arith.addf %249, %251 : vector<16x32xf32>
    %253 = arith.addf %252, %229 : vector<16x32xf32>
    %c16 = arith.constant 16 : index
    %c0_88 = arith.constant 0 : index
    %254 = vector.load %arg5[%c16, %c0_88] : memref<19x128xf32, #tpu.memory_space<vmem>>, vector<1x32xf32>
    %c17 = arith.constant 17 : index
    %c0_89 = arith.constant 0 : index
    %255 = vector.load %arg5[%c17, %c0_89] : memref<19x128xf32, #tpu.memory_space<vmem>>, vector<1x32xf32>
    %cst_90 = arith.constant dense<0.000000e+00> : vector<16xf32>
    %256 = vector.multi_reduction <add>, %253, %cst_90 [1] : vector<16x32xf32> to vector<16xf32>
    %257 = vector.shape_cast %256 : vector<16xf32> to vector<16x1xf32>
    %cst_91 = arith.constant 3.200000e+01 : f32
    %258 = vector.broadcast %cst_91 : f32 to vector<16x1xf32>
    %259 = arith.divf %257, %258 : vector<16x1xf32>
    %260 = vector.broadcast %259 : vector<16x1xf32> to vector<16x32xf32>
    %261 = arith.subf %253, %260 : vector<16x32xf32>
    %262 = arith.mulf %261, %261 : vector<16x32xf32>
    %cst_92 = arith.constant dense<0.000000e+00> : vector<16xf32>
    %263 = vector.multi_reduction <add>, %262, %cst_92 [1] : vector<16x32xf32> to vector<16xf32>
    %264 = vector.shape_cast %263 : vector<16xf32> to vector<16x1xf32>
    %cst_93 = arith.constant 3.200000e+01 : f32
    %265 = vector.broadcast %cst_93 : f32 to vector<16x1xf32>
    %266 = arith.divf %264, %265 : vector<16x1xf32>
    %cst_94 = arith.constant 9.99999996E-13 : f32
    %267 = vector.broadcast %cst_94 : f32 to vector<16x1xf32>
    %268 = arith.addf %266, %267 : vector<16x1xf32>
    %269 = math.rsqrt %268 : vector<16x1xf32>
    %270 = vector.broadcast %269 : vector<16x1xf32> to vector<16x32xf32>
    %271 = arith.mulf %261, %270 : vector<16x32xf32>
    %272 = vector.broadcast %254 : vector<1x32xf32> to vector<16x32xf32>
    %273 = arith.mulf %271, %272 : vector<16x32xf32>
    %274 = vector.broadcast %255 : vector<1x32xf32> to vector<16x32xf32>
    %275 = arith.addf %273, %274 : vector<16x32xf32>
    %276 = tpu.iota {dimensions = array<i32: 0>} : vector<2x16xi32>
    %277 = tpu.iota {dimensions = array<i32: 1>} : vector<2x16xi32>
    %c8_i32 = arith.constant 8 : i32
    %278 = vector.broadcast %c8_i32 : i32 to vector<2x16xi32>
    %279 = arith.muli %276, %278 : vector<2x16xi32>
    %280 = arith.cmpi eq, %277, %279 : vector<2x16xi32>
    %281 = arith.extui %280 : vector<2x16xi1> to vector<2x16xi32>
    %282 = arith.sitofp %281 : vector<2x16xi32> to vector<2x16xf32>
    %cst_95 = arith.constant dense<0.000000e+00> : vector<2x32xf32>
    %283 = tpu.matmul %282, %275, %cst_95 {dimension_numbers = #tpu.dot_dimension_numbers<[1], [0], [0], [1], [0, 0, 1, 1], [], []>} : vector<2x16xf32>, vector<16x32xf32>, vector<2x32xf32> -> vector<2x32xf32>
    %c392 = arith.constant 392 : index
    %c0_96 = arith.constant 0 : index
    %284 = vector.load %arg4[%c392, %c0_96] : memref<424x128xf32, #tpu.memory_space<vmem>>, vector<32x1xf32>
    %cst_97 = arith.constant dense<0.000000e+00> : vector<2x1xf32>
    %285 = tpu.matmul %283, %284, %cst_97 {dimension_numbers = #tpu.dot_dimension_numbers<[1], [0], [0], [1], [0, 0, 1, 1], [], []>} : vector<2x32xf32>, vector<32x1xf32>, vector<2x1xf32> -> vector<2x1xf32>
    %c18 = arith.constant 18 : index
    %c0_98 = arith.constant 0 : index
    %286 = vector.load %arg5[%c18, %c0_98] : memref<19x128xf32, #tpu.memory_space<vmem>>, vector<1x1xf32>
    %287 = vector.broadcast %286 : vector<1x1xf32> to vector<2x1xf32>
    %288 = arith.addf %285, %287 : vector<2x1xf32>
    %cst_99 = arith.constant 1.000000e+00 : f32
    %289 = vector.broadcast %cst_99 : f32 to vector<2x1xf32>
    %290 = arith.mulf %288, %289 : vector<2x1xf32>
    %c0_100 = arith.constant 0 : index
    %c0_101 = arith.constant 0 : index
    %291 = vector.load %arg6[%c0_100, %c0_101] : memref<2x1xf32, #tpu.memory_space<vmem>>, vector<2x1xf32>
    tpu.vector_store %arg6[%c0_100, %c0_101], %290 {strides = array<i32>} : memref<2x1xf32, #tpu.memory_space<vmem>>, vector<2x1xf32>,
    return
  }
  func.func @transform_0(%arg0: i32) -> (i32, i32) {
    %c0_i32 = arith.constant 0 : i32
    %c0_i32_0 = arith.constant 0 : i32
    %c0_i32_1 = arith.constant 0 : i32
    return %c0_i32, %c0_i32_0 : i32, i32
  }
  func.func @transform_1(%arg0: i32) -> (i32, i32) {
    %c0_i32 = arith.constant 0 : i32
    %c0_i32_0 = arith.constant 0 : i32
    %c0_i32_1 = arith.constant 0 : i32
    return %c0_i32, %c0_i32_0 : i32, i32
  }
  func.func @transform_2(%arg0: i32) -> (i32, i32) {
    %c0_i32 = arith.constant 0 : i32
    %c0_i32_0 = arith.constant 0 : i32
    %c0_i32_1 = arith.constant 0 : i32
    return %c0_i32, %c0_i32_0 : i32, i32
  }
  func.func @transform_3(%arg0: i32) -> (i32, i32) {
    %c0_i32 = arith.constant 0 : i32
    %c0_i32_0 = arith.constant 0 : i32
    %c0_i32_1 = arith.constant 0 : i32
    return %c0_i32, %c0_i32_0 : i32, i32
  }
  func.func @transform_4(%arg0: i32) -> (i32, i32) {
    %c0_i32 = arith.constant 0 : i32
    %c0_i32_0 = arith.constant 0 : i32
    %c0_i32_1 = arith.constant 0 : i32
    return %c0_i32, %c0_i32_0 : i32, i32
  }
  func.func @transform_5(%arg0: i32) -> (i32, i32) {
    %c0_i32 = arith.constant 0 : i32
    %c0_i32_0 = arith.constant 0 : i32
    %c0_i32_1 = arith.constant 0 : i32
    return %c0_i32, %c0_i32_0 : i32, i32
  }
}

</mosaic_0001>

<bundles_post_ra>
// kernel: eq.8
= control target key start
LH: loop header
LB: loop body
LE: loop exit
PB: predicated region body
PF: predicated region fallthrough
CT: control target
= control target key end

     0   :  { %vm7_vm0 = vcmask 64512   ;;  %vm13_vm1 = vcmask 130112   ;;  %s39_s0 = inlined_call_operand.vmem [shape: s32[2,8], index: 0, kind: input, shape index: {}]   ;;  %s40_s1 = inlined_call_operand.vmem [shape: s32[16], index: 1, kind: output, shape index: {}]  }
   0x1   :  { %v4_v0 = vld [vmem:[%s39_s0] sm:$0x3]  ;;  %s22_s0 = smov 8  }
   0x2   :  { %5 = vst [vmem:[#allocation1] sm:$0x3] %v4_v0 }
   0x9   :  { %v10_v1 = vld [vmem:[#allocation1 + $0x1] sm:$0x1]   ;;  %v6_v2 = vld [vmem:[#allocation1] sm:$0x1]  }
   0xa   :  { %11 = vrot.lane.b32.xlu0 %v10_v1, %s22_s0  ;;  %8 = vst.msk [vmem:[#allocation0] sm:$0x1] %vm7_vm0, %v6_v2  }
  0x7c   :  { %v12_v3 = vpop.permute.xlu0 %11  }
  0x7d   :  { %14 = vst.msk [vmem:[#allocation0] sm:$0x1] %vm13_vm1, %v12_v3  }
  0x84   :  { %v18_v4 = vld [vmem:[#allocation0] sm:$0x1] }
  0x85   :  { %20 = vst [vmem:[%s40_s1] sm:$0x1] %v18_v4 }

// kernel: cross_encoder_forward.1
= control target key start
LH: loop header
LB: loop body
LE: loop exit
PB: predicated region body
PF: predicated region fallthrough
CT: control target
= control target key end

     0   :  { %10 = vsyncpa [#allocation3], 0  ;;  %s2810_s18 = smov [#allocation2]   ;;  %s3120_s0 = inlined_call_operand.vmem [shape: s32[16,1], index: 0, kind: input, shape index: {}]   ;;  %s3121_s1 = inlined_call_operand.vmem [shape: s32[16,1], index: 1, kind: input, shape index: {}]   ;;  %s3122_s2 = inlined_call_operand.vmem [shape: f32[16,16], index: 2, kind: input, shape index: {}]   ;;  %s3123_s3 = inlined_call_operand.hbm [shape: f32[424,128], index: 3, kind: input, shape index: {}]   ;;  %s3124_s4 = inlined_call_operand.vmem [shape: f32[19,128], index: 4, kind: input, shape index: {}]   ;;  %s3125_s5 = inlined_call_operand.vmem [shape: f32[2,1], index: 5, kind: output, shape index: {}]  }
   0x1   :  { %s22_s19 = sshll.u32 %s2810_s18, 4  ;;  %s2786_s22 = scalar_lea.hbm %s3123_s3, 6784  ;;  %s23_s19 = int_to_ptr.vmem [resolvable:$true] %s22_s19 }
   0x2   :  { %p2787_p0 = scmp.ne.s32.totalorder %s3123_s3, %s2786_s22  ;;  %p2790_p1 = scmp.lt.u32.totalorder %s2786_s22, %s3123_s3 }
   0x4   :  { %p2792_p2 = pnand %p2790_p1, %p2787_p0 }
   0x6   :  { %2795 = shalt.err (!%p2792_p2)
}
   0x7   :  { %s2796_s27 = scalar_lea.vmem %s23_s19, 6784  ;;  %p2801_p4 = scmp.lt.s32.totalorder %s23_s19, %s23_s19 }
   0x8   :  { %p2797_p3 = scmp.ne.s32.totalorder %s23_s19, %s2796_s27  ;;  %p2802_p5 = scmp.lt.s32.totalorder %s2796_s27, %s2796_s27 }
   0xa   :  { %p2803_p6 = por %p2802_p5, %p2801_p4 }
   0xc   :  { %p2804_p7 = pnand %p2803_p6, %p2797_p3 }
   0xe   :  { %2807 = shalt.err (!%p2804_p7)
}
   0xf   :  { %s2811_s28 = smov 128   ;;  %s2812_s29 = smov 8  }
  0x10   :  { %28 = dma.hbm_to_vmem [thread:$0]  %s3123_s3, 6784, %s23_s19, [#allocation3], %s2811_s28, %s2811_s28, %s2812_s29  }
  0x11   :  { %2808 = dma.done.wait [#allocation3], 6784  }
  0x12   :  { %2809 = vsyncadd [#allocation3], 4294960512  ;;  %v2813_v0 = vmov 0   ;;  %v40_v1 = vld [vmem:[%s3120_s0 + $0x8] sm:$0xff]  ;;  %v39_v2 = vld [vmem:[%s3120_s0] sm:$0xff]  ;;  %v34_v20 = vlaneseq  ;;  %v2814_v32 = vmov 0.0  }
  0x13   :  { %2685 = vset.pattern.permute.xlu1 %v2813_v0  ;;  %2684 = vset.pattern.permute.xlu0 %v2813_v0  ;;  %v54_v3 = vld [vmem:[%s3121_s1 + $0x8] sm:$0xff]  ;;  %v53_v5 = vld [vmem:[%s3121_s1] sm:$0xff]  ;;  %v85_v10 = vld [vmem:[#allocation2 + $0x10] sm:$0xff]  ;;  %vm92_vm6 = vcmask 588800   ;;  %vm176_vm7 = vcmask 261120   ;;  %vm314_vm8 = vcmask 130048  }
  0x14   :  { %45 = vperm.xlu1 %2685, %v40_v1   ;;  %42 = vperm.xlu0 %2684, %v39_v2   ;;  %v56_v4 = vadd.s32 50, %v54_v3  ;;  %v83_v6 = vld [vmem:[#allocation2] sm:$0xff]  ;;  %v84_v7 = vld [vmem:[#allocation2 + $0x8] sm:$0xff]  ;;  %v55_v8 = vadd.s32 50, %v53_v5  ;;  %v86_v11 = vld [vmem:[#allocation2 + $0x18] sm:$0xff]  ;;  %v2877_v21 = vshrl.u32 %v34_v20, 7 }
  0x15   :  { %v2526_v9 = vpack.c.bf16 %v84_v7, %v83_v6  ;;  %v2530_v12 = vpack.c.bf16 %v86_v11, %v85_v10  ;;  %v87_v13 = vld [vmem:[#allocation2 + $0x20] sm:$0xff]  ;;  %v88_v14 = vld [vmem:[#allocation2 + $0x28] sm:$0xff]  ;;  %v89_v16 = vld [vmem:[#allocation2 + $0x30] sm:$0xff]  ;;  %v2881_v27 = vand.u32 127, %v34_v20  ;;  %s2815_s18 = smov 80   ;;  %s2816_s19 = smov 96  }
  0x16   :  { %v2534_v15 = vpack.c.bf16 %v88_v14, %v87_v13  ;;  %v90_v17 = vld [vmem:[#allocation2 + $0x38] sm:$0xff]  ;;  %v91_v19 = vld [vmem:[#allocation2 + $0x40] sm:$0xff]  ;;  %v38_v22 = vadd.s32 8, %v2877_v21  ;;  %v71_v24 = vand.u32 7, %v2877_v21  ;;  %v218_v57 = vld [vmem:[#allocation2 + $0x48] sm:$0xff]  ;;  %s2817_s20 = smov 112  }
  0x17   :  { %2527 = vmatprep.subr.bf16.mxu0 %v2526_v9  ;;  %v2538_v18 = vpack.c.bf16 %v90_v17, %v89_v16  ;;  %v219_v58 = vld [vmem:[#allocation2 + $0x50] sm:$0xff]  ;;  %v220_v59 = vld [vmem:[#allocation2 + $0x58] sm:$0xff]  ;;  %v221_v61 = vld [vmem:[#allocation2 + $0x60] sm:$0xff]  ;;  %s2819_s25 = smov 48   ;;  %s2820_s26 = smov 16   ;;  %vm978_vm10 = vcmask 523264  }
  0x18   :  { %61 = vperm.xlu1 %2685, %v56_v4   ;;  %58 = vperm.xlu0 %2684, %v55_v8   ;;  %v72_v23 = vand.u32 7, %v38_v22  ;;  %v73_v26 = vadd.s32 53, %v71_v24  ;;  %v2542_v60 = vpack.c.bf16 %v219_v58, %v218_v57  ;;  %v2546_v62 = vpack.c.bf16 %v221_v61, %v220_v59  ;;  %v2158_v6 = vld [vmem:[%s3124_s4] ss:$0 sm:$0xff]  ;;  %v2159_v8 = vld [vmem:[%s3124_s4 + $0x1] ss:$0 sm:$0xff]  ;;  %vm2927_vm9 = vmpackc.low %vm314_vm8, %vm314_vm8 }
  0x19   :  { %2529 = vmatpush3.bf16.msra.mxu0 %v2526_v9  ;;  %vm2822_vm11 = vmmov 0   ;;  %vm2143_vm13 = vcmask 1024  }
  0x1a   :  { %2531 = vmatprep.subr.bf16.mxu0 %v2530_v12  ;;  %v74_v25 = vadd.s32 53, %v72_v23  ;;  %vm75_vm1 = vcmp.eq.s32.totalorder %v2881_v27, %v73_v26  ;;  %2543 = vmatprep.subr.bf16.mxu1 %v2542_v60 }
  0x1b   :  { %v2154_v34 = vsel %vm75_vm1, 1.0, %v2814_v32  ;;  %2545 = vmatpush3.bf16.msra.mxu1 %v2542_v60 }
  0x1c   :  { %vm76_vm0 = vcmp.eq.s32.totalorder %v2881_v27, %v74_v25  ;;  %2547 = vmatprep.subr.bf16.mxu1 %v2546_v62 }
  0x1d   :  { %2533 = vmatpush3.bf16.msra.mxu0 %v2530_v12  ;;  %v2155_v33 = vsel %vm76_vm0, 1.0, %v2814_v32 }
  0x1e   :  { %2535 = vmatprep.subr.bf16.mxu0 %v2534_v15 }
  0x1f   :  { %2549 = vmatpush3.bf16.msra.mxu1 %v2546_v62 }
  0x21   :  { %2537 = vmatpush3.bf16.msra.mxu0 %v2534_v15  ;;  %v2160_v15 = vld [vmem:[%s3124_s4 + $0x2] ss:$0 sm:$0xff] }
  0x22   :  { %2539 = vmatprep.subr.bf16.mxu0 %v2538_v18 }
  0x25   :  { %2541 = vmatpush3.bf16.msra.mxu0 %v2538_v18 }
  0x26   :  { %2343 = vmatprep.subr.mxu0 %v91_v19 }
  0x29   :  { %2344 = vmatpush3.msra.mxu0 %v91_v19 }
  0x93   :  { %v46_v28 = vpop.permute.xlu1 %45  ;;  %v43_v29 = vpop.permute.xlu0 %42 }
  0x94   :  { %vm48_vm2 = vcmp.eq.s32.totalorder %v2881_v27, %v46_v28  ;;  %vm47_vm3 = vcmp.eq.s32.totalorder %v2881_v27, %v43_v29 }
  0x95   :  { %v2151_v35 = vsel %vm48_vm2, 1.0, %v2814_v32  ;;  %v2150_v36 = vsel %vm47_vm3, 1.0, %v2814_v32 }
  0x97   :  { %v62_v30 = vpop.permute.xlu1 %61  ;;  %v59_v31 = vpop.permute.xlu0 %58 }
  0x98   :  { %vm64_vm4 = vcmp.eq.s32.totalorder %v2881_v27, %v62_v30  ;;  %vm63_vm5 = vcmp.eq.s32.totalorder %v2881_v27, %v59_v31 }
  0x99   :  { %v2153_v37 = vsel %vm64_vm4, 1.0, %v2814_v32  ;;  %v2152_v38 = vsel %vm63_vm5, 1.0, %v2814_v32 }
  0x9a   :  { %v70_v39 = vadd.f32 %v2153_v37, %v2151_v35  ;;  %v69_v40 = vadd.f32 %v2152_v38, %v2150_v36  ;;  %v2945_v36 = vld [vmem:[%s3122_s2 + $0x8] sm:$0xff] }
  0x9c   :  { %v82_v41 = vadd.f32 %v2155_v33, %v70_v39  ;;  %v81_v42 = vadd.f32 %v2154_v34, %v69_v40  ;;  %v2950_v40 = vld [vmem:[%s3122_s2] sm:$0xff]  ;;  %s2818_s2 = smov 64  }
  0x9e   :  { %2345 = vmatprep.mubr.msk.f32.mxu0 %vm92_vm6, %v81_v42 }
  0x9f   :  { %2346 = vmatmul.mubr.msk.f32.vlgmr.msra.gmra.mrb[0].mxu0 %vm92_vm6, %v82_v41 }
 0x172   :  { %v2347_v43 = vpop.f32.mrb[0].mxu0 }
 0x173   :  { %v165_v44 = vpop.f32.mrb[1].mxu0  ;;  %v180_v45 = vsel %vm176_vm7, %v2347_v43, 0.0 }
 0x174   :  { %181 = vadd.xlane.f32.xlu1 %v180_v45  ;;  %v177_v46 = vsel %vm176_vm7, %v165_v44, 0.0 }
 0x175   :  { %178 = vadd.xlane.f32.xlu0 %v177_v46 }
 0x201   :  { %v182_v47 = vpop.xlane.xlu1 %181 }
 0x202   :  { %v185_v48 = vmul.f32 0.03125, %v182_v47  ;;  %v179_v49 = vpop.xlane.xlu0 %178 }
 0x203   :  { %v184_v50 = vmul.f32 0.03125, %v179_v49 }
 0x204   :  { %v187_v51 = vsub.f32 %v2347_v43, %v185_v48 }
 0x205   :  { %v186_v52 = vsub.f32 %v165_v44, %v184_v50 }
 0x206   :  { %v189_v55 = vmul.f32 %v187_v51, %v187_v51 }
 0x207   :  { %v188_v53 = vmul.f32 %v186_v52, %v186_v52 }
 0x208   :  { %v193_v56 = vsel %vm176_vm7, %v189_v55, 0.0 }
 0x209   :  { %v190_v54 = vsel %vm176_vm7, %v188_v53, 0.0 }
 0x20a   :  { %191 = vadd.xlane.f32.xlu0 %v190_v54 }
 0x20e   :  { %194 = vadd.xlane.f32.xlu0 %v193_v56 }
 0x297   :  { %v192_v63 = vpop.xlane.xlu0 %191 }
 0x298   :  { %v196_v0 = vmul.f32 0.03125, %v192_v63 }
 0x29a   :  { %v198_v1 = vadd.f32 1e-12, %v196_v0 }
 0x29b   :  { %v195_v2 = vpop.xlane.xlu0 %194 }
 0x29c   :  { %2726 = vrsqrt.f32 %v198_v1  ;;  %v197_v3 = vmul.f32 0.03125, %v195_v2 }
 0x29e   :  { %v199_v4 = vadd.f32 1e-12, %v197_v3 }
 0x2a0   :  { %2728 = vrsqrt.f32 %v199_v4 }
 0x2a6   :  { %v2727_v5 = vpop.eup %2726 }
 0x2a7   :  { %v202_v7 = vmul.f32 %v2727_v5, %v186_v52 }
 0x2a9   :  { %v208_v9 = vmul.f32 %v2158_v6, %v202_v7 }
 0x2aa   :  { %v2729_v10 = vpop.eup %2728 }
 0x2ab   :  { %v203_v11 = vmul.f32 %v2729_v10, %v187_v51  ;;  %v2905_v12 = vadd.f32 %v2159_v8, %v208_v9 }
 0x2ad   :  { %v209_v13 = vmul.f32 %v2158_v6, %v203_v11  ;;  %2356 = vmatprep.mubr.msk.f32.mxu1 %vm176_vm7, %v2905_v12 }
 0x2af   :  { %v2909_v14 = vadd.f32 %v2159_v8, %v209_v13 }
 0x2b1   :  { %2357 = vmatmul.mubr.msk.f32.vlgmr.msra.gmra.mrb[0].mxu1 %vm176_vm7, %v2909_v14 }
 0x384   :  { %v2358_v16 = vpop.f32.mrb[0].mxu1 }
 0x385   :  { %v305_v17 = vadd.f32 %v2358_v16, %v2160_v15  ;;  %v299_v18 = vpop.f32.mrb[1].mxu1 }
 0x386   :  { %v300_v19 = vadd.f32 %v2160_v15, %v299_v18 }
 0x388   :  { %2363 = vmatprep.mubr.msk.f32.mxu1 %vm314_vm8, %v300_v19  ;;  %v2917_v20 = vpack.i.bf16 %v305_v17, %v300_v19 }
 0x38a   :  { %2692 = vrot.lane.b32.xlu0 %v2917_v20, %s2815_s18  ;;  %2687 = vrot.lane.b32.xlu1 %v2917_v20, %s2816_s19 }
 0x38e   :  { %511 = vrot.lane.b32.xlu1 %v300_v19, %s2817_s20 }
 0x392   :  { %513 = vrot.lane.b32.xlu1 %v305_v17, %s2817_s20 }
 0x3fc   :  { %v2693_v22 = vpop.permute.xlu0 %2692  ;;  %v2688_v23 = vpop.permute.xlu1 %2687 }
 0x3fd   :  { %v2695_v24 = vunpack.i.h.bf16 %v2693_v22  ;;  %v2694_v25 = vunpack.i.l.bf16 %v2693_v22  ;;  %v2690_v26 = vunpack.i.h.bf16 %v2688_v23  ;;  %v2689_v28 = vunpack.i.l.bf16 %v2688_v23 }
 0x3ff   :  { %v2560_v30 = vpack.c.bf16 %v2695_v24, %v2694_v25  ;;  %v2550_v31 = vpack.c.bf16 %v2690_v26, %v2689_v28 }
 0x400   :  { %v512_v33 = vpop.permute.xlu1 %511 }
 0x401   :  { %2552 = vmatprep.subr.msk.bf16.mxu1 %vm2927_vm9, %v2550_v31  ;;  %2562 = vmatprep.subr.msk.bf16.mxu0 %vm2927_vm9, %v2560_v30 }
 0x402   :  { %2377 = vmatprep.mubr.msk.f32.mxu0 %vm314_vm8, %v512_v33  ;;  %2555 = vmatpush3.bf16.xpose.msk.msra.mxu1 %vm2927_vm9, %v2550_v31 }
 0x403   :  { %2565 = vmatpush3.bf16.xpose.msk.msra.mxu0 %vm2927_vm9, %v2560_v30 }
 0x404   :  { %v514_v34 = vpop.permute.xlu1 %513 }
 0x409   :  { %2364 = vmatmul.mubr.msk.f32.vlgmr.msra.gmra.mrb[2].mxu1 %vm314_vm8, %v305_v17 }
 0x40a   :  { %2378 = vmatmul.mubr.msk.f32.vlgmr.msra.gmra.mrb[2].mxu0 %vm314_vm8, %v514_v34 }
 0x4dc   :  { %v2365_v35 = vpop.f32.mrb[2].mxu1 }
 0x4dd   :  { %v399_v37 = vmul.f32 0.25, %v2365_v35  ;;  %v2379_v38 = vpop.f32.mrb[2].mxu0  ;;  %v389_v39 = vpop.f32.mrb[3].mxu1  ;;  %v725_v35 = vld [vmem:[#allocation2 + $0x68] sm:$0xff] }
 0x4de   :  { %v398_v41 = vmul.f32 0.25, %v389_v39  ;;  %v593_v42 = vpop.f32.mrb[3].mxu0  ;;  %v603_v47 = vmul.f32 0.25, %v2379_v38  ;;  %v727_v39 = vld [vmem:[#allocation2 + $0x78] sm:$0xff] }
 0x4df   :  { %v602_v43 = vmul.f32 0.25, %v593_v42  ;;  %v401_v44 = vadd.f32 %v399_v37, %v2945_v36  ;;  %v726_v37 = vld [vmem:[#allocation2 + $0x70] sm:$0xff] }
 0x4e0   :  { %v400_v45 = vadd.f32 %v398_v41, %v2950_v40  ;;  %v605_v51 = vadd.f32 %v603_v47, %v2945_v36  ;;  %v2570_v38 = vpack.c.bf16 %v726_v37, %v725_v35  ;;  %v728_v41 = vld [vmem:[#allocation2 + $0x80] sm:$0xff]  ;;  %v967_v35 = vld [vmem:[#allocation2 + $0xb8] sm:$0xff] }
 0x4e1   :  { %v405_v46 = vsel %vm314_vm8, %v401_v44, -inf  ;;  %v604_v49 = vadd.f32 %v602_v43, %v2950_v40  ;;  %v2574_v42 = vpack.c.bf16 %v728_v41, %v727_v39  ;;  %v968_v37 = vld [vmem:[#allocation2 + $0xc0] sm:$0xff]  ;;  %v969_v39 = vld [vmem:[#allocation2 + $0xc8] sm:$0xff]  ;;  %v970_v41 = vld [vmem:[#allocation2 + $0xd0] sm:$0xff] }
 0x4e2   :  { %406 = vmax.xlane.f32.xlu1 %v405_v46  ;;  %v402_v48 = vsel %vm314_vm8, %v400_v45, -inf  ;;  %v609_v52 = vsel %vm314_vm8, %v605_v51, -inf }
 0x4e3   :  { %403 = vmax.xlane.f32.xlu0 %v402_v48  ;;  %v606_v50 = vsel %vm314_vm8, %v604_v49, -inf }
 0x4e7   :  { %607 = vmax.xlane.f32.xlu0 %v606_v50 }
 0x4eb   :  { %610 = vmax.xlane.f32.xlu0 %v609_v52 }
 0x56f   :  { %v407_v53 = vpop.xlane.xlu1 %406 }
 0x570   :  { %v409_v54 = vsub.f32 %v401_v44, %v407_v53  ;;  %v404_v55 = vpop.xlane.xlu0 %403 }
 0x571   :  { %v408_v56 = vsub.f32 %v400_v45, %v404_v55 }
 0x572   :  { %v412_v57 = vmul.f32 1.442695, %v409_v54 }
 0x573   :  { %v410_v58 = vmul.f32 1.442695, %v408_v56 }
 0x574   :  { %2730 = vpow2.f32 %v412_v57  ;;  %v608_v59 = vpop.xlane.xlu0 %607 }
 0x575   :  { %2732 = vpow2.f32 %v410_v58  ;;  %v612_v60 = vsub.f32 %v604_v49, %v608_v59 }
 0x577   :  { %v614_v61 = vmul.f32 1.442695, %v612_v60 }
 0x578   :  { %v611_v62 = vpop.xlane.xlu0 %610 }
 0x579   :  { %2734 = vpow2.f32 %v614_v61  ;;  %v613_v63 = vsub.f32 %v605_v51, %v611_v62  ;;  %v2175_v51 = vld [vmem:[%s3124_s4 + $0x3] ss:$0 sm:$0xff] }
 0x57b   :  { %v616_v0 = vmul.f32 1.442695, %v613_v63 }
 0x57d   :  { %2736 = vpow2.f32 %v616_v0 }
 0x57e   :  { %v2731_v1 = vpop.eup %2730 }
 0x57f   :  { %v2733_v2 = vpop.eup %2732  ;;  %v417_v3 = vsel %vm314_vm8, %v2731_v1, 0.0 }
 0x580   :  { %418 = vadd.xlane.f32.xlu0 %v417_v3  ;;  %v414_v4 = vsel %vm314_vm8, %v2733_v2, 0.0 }
 0x581   :  { %415 = vadd.xlane.f32.xlu1 %v414_v4 }
 0x583   :  { %v2735_v5 = vpop.eup %2734 }
 0x584   :  { %v618_v6 = vsel %vm314_vm8, %v2735_v5, 0.0 }
 0x585   :  { %619 = vadd.xlane.f32.xlu1 %v618_v6 }
 0x587   :  { %v2737_v7 = vpop.eup %2736 }
 0x588   :  { %v621_v8 = vsel %vm314_vm8, %v2737_v7, 0.0 }
 0x589   :  { %622 = vadd.xlane.f32.xlu0 %v621_v8  ;;  %v860_v8 = vld [vmem:[#allocation2 + $0xa0] sm:$0xff] }
 0x596   :  { %2697 = vrot.lane.b32.xlu1 %v2917_v20, %s2818_s2 }
 0x59f   :  { %2702 = vrot.lane.b32.xlu0 %v2917_v20, %s2819_s25 }
 0x60d   :  { %v419_v9 = vpop.xlane.xlu0 %418 }
 0x60e   :  { %v416_v10 = vpop.xlane.xlu1 %415 }
 0x60f   :  { %2738 = vrcp.f32 %v416_v10 }
 0x610   :  { %2740 = vrcp.f32 %v419_v9 }
 0x612   :  { %v620_v11 = vpop.xlane.xlu1 %619 }
 0x613   :  { %2742 = vrcp.f32 %v620_v11 }
 0x616   :  { %v2698_v13 = vpop.permute.xlu1 %2697  ;;  %v623_v15 = vpop.xlane.xlu0 %622 }
 0x617   :  { %v2700_v16 = vunpack.i.h.bf16 %v2698_v13  ;;  %v2699_v17 = vunpack.i.l.bf16 %v2698_v13  ;;  %2744 = vrcp.f32 %v623_v15 }
 0x619   :  { %v2739_v18 = vpop.eup %2738  ;;  %v2556_v19 = vpack.c.bf16 %v2700_v16, %v2699_v17 }
 0x61a   :  { %v2741_v22 = vpop.eup %2740  ;;  %v2703_v23 = vpop.permute.xlu0 %2702  ;;  %v421_v24 = vmul.f32 %v2739_v18, %v2733_v2 }
 0x61b   :  { %v2705_v25 = vunpack.i.h.bf16 %v2703_v23  ;;  %v2704_v26 = vunpack.i.l.bf16 %v2703_v23  ;;  %2557 = vmatprep.subr.bf16.mxu1 %v2556_v19  ;;  %v423_v28 = vmul.f32 %v2741_v22, %v2731_v1  ;;  %v2179_v23 = vld [vmem:[%s3124_s4 + $0x5] ss:$0 sm:$0xff] }
 0x61c   :  { %2559 = vmatpush3.bf16.msra.mxu1 %v2556_v19  ;;  %2370 = vmatprep.mubr.msk.f32.mxu1 %vm314_vm8, %v421_v24  ;;  %v2178_v19 = vld [vmem:[%s3124_s4 + $0x4] ss:$0 sm:$0xff] }
 0x61d   :  { %v2743_v20 = vpop.eup %2742  ;;  %v2566_v30 = vpack.c.bf16 %v2705_v25, %v2704_v26 }
 0x61e   :  { %v625_v31 = vmul.f32 %v2743_v20, %v2735_v5  ;;  %v858_v5 = vld [vmem:[#allocation2 + $0x90] sm:$0xff] }
 0x61f   :  { %2371 = vmatmul.mubr.msk.f32.vlgmr.msra.gmra.mrb[4].mxu1 %vm314_vm8, %v423_v28  ;;  %2567 = vmatprep.subr.bf16.mxu1 %v2566_v30 }
 0x620   :  { %2569 = vmatpush3.bf16.msra.mxu1 %v2566_v30  ;;  %2384 = vmatprep.mubr.msk.f32.mxu1 %vm314_vm8, %v625_v31  ;;  %v965_v31 = vld [vmem:[#allocation2 + $0xa8] sm:$0xff] }
 0x621   :  { %v2745_v33 = vpop.eup %2744  ;;  %2571 = vmatprep.subr.bf16.mxu1 %v2570_v38 }
 0x622   :  { %v627_v34 = vmul.f32 %v2745_v33, %v2737_v7  ;;  %v859_v7 = vld [vmem:[#allocation2 + $0x98] sm:$0xff]  ;;  %v966_v33 = vld [vmem:[#allocation2 + $0xb0] sm:$0xff] }
 0x623   :  { %v2582_v9 = vpack.c.bf16 %v860_v8, %v859_v7 }
 0x624   :  { %2385 = vmatmul.mubr.msk.f32.vlgmr.msra.gmra.mrb[6].mxu1 %vm314_vm8, %v627_v34  ;;  %v2586_v34 = vpack.c.bf16 %v966_v33, %v965_v31  ;;  %v1105_v31 = vld [vmem:[#allocation2 + $0x100] sm:$0xff] }
 0x625   :  { %2573 = vmatpush3.bf16.msra.mxu1 %v2570_v38  ;;  %v2590_v38 = vpack.c.bf16 %v968_v37, %v967_v35 }
 0x626   :  { %2575 = vmatprep.subr.bf16.mxu1 %v2574_v42 }
 0x629   :  { %2577 = vmatpush3.bf16.msra.mxu1 %v2574_v42  ;;  %v2594_v42 = vpack.c.bf16 %v970_v41, %v969_v39 }
 0x62a   :  { %2587 = vmatprep.subr.bf16.mxu1 %v2586_v34 }
 0x6f2   :  { %v2372_v43 = vpop.f32.mrb[4].mxu1 }
 0x6f3   :  { %v502_v44 = vpop.f32.mrb[5].mxu1 }
 0x6f7   :  { %v2386_v45 = vpop.f32.mrb[6].mxu1 }
 0x6f8   :  { %v706_v46 = vpop.f32.mrb[7].mxu1 }
 0x6f9   :  { %717 = vrot.lane.b32.xlu1 %v706_v46, %s2820_s26  ;;  %v2180_v46 = vld [vmem:[%s3124_s4 + $0x6] ss:$0 sm:$0xff] }
 0x6fd   :  { %719 = vrot.lane.b32.xlu1 %v2386_v45, %s2820_s26 }
 0x76b   :  { %v718_v47 = vpop.permute.xlu1 %717 }
 0x76c   :  { %v723_v48 = vsel %vm314_vm8, %v502_v44, %v718_v47  ;;  %v972_v44 = vld [vmem:[#allocation2 + $0xe0] sm:$0xff] }
 0x76d   :  { %2395 = vmatprep.mubr.msk.f32.mxu1 %vm176_vm7, %v723_v48 }
 0x76f   :  { %v720_v49 = vpop.permute.xlu1 %719 }
 0x770   :  { %v724_v50 = vsel %vm314_vm8, %v2372_v43, %v720_v49  ;;  %v971_v43 = vld [vmem:[#allocation2 + $0xd8] sm:$0xff] }
 0x771   :  { %2396 = vmatmul.mubr.msk.f32.vlgmr.msra.gmra.mrb[8].mxu1 %vm176_vm7, %v724_v50  ;;  %v2598_v45 = vpack.c.bf16 %v972_v44, %v971_v43  ;;  %v2186_v43 = vld [vmem:[%s3124_s4 + $0x8] ss:$0 sm:$0xff] }
 0x772   :  { %2589 = vmatpush3.bf16.msra.mxu1 %v2586_v34 }
 0x773   :  { %2591 = vmatprep.subr.bf16.mxu1 %v2590_v38 }
 0x776   :  { %2593 = vmatpush3.bf16.msra.mxu1 %v2590_v38 }
 0x777   :  { %2595 = vmatprep.subr.bf16.mxu1 %v2594_v42 }
 0x77a   :  { %2597 = vmatpush3.bf16.msra.mxu1 %v2594_v42 }
 0x77b   :  { %2599 = vmatprep.subr.bf16.mxu1 %v2598_v45 }
 0x77e   :  { %2601 = vmatpush3.bf16.msra.mxu1 %v2598_v45 }
 0x844   :  { %v2397_v52 = vpop.f32.mrb[8].mxu1 }
 0x845   :  { %v812_v53 = vadd.f32 %v2397_v52, %v2175_v51  ;;  %v806_v54 = vpop.f32.mrb[9].mxu1 }
 0x846   :  { %v807_v55 = vadd.f32 %v2175_v51, %v806_v54 }
 0x847   :  { %v816_v56 = vadd.f32 %v812_v53, %v2909_v14 }
 0x848   :  { %v815_v57 = vadd.f32 %v807_v55, %v2905_v12  ;;  %v857_v12 = vld [vmem:[#allocation2 + $0x88] sm:$0xff] }
 0x849   :  { %v822_v58 = vsel %vm176_vm7, %v816_v56, 0.0  ;;  %v2578_v6 = vpack.c.bf16 %v858_v5, %v857_v12 }
 0x84a   :  { %823 = vadd.xlane.f32.xlu1 %v822_v58  ;;  %v819_v59 = vsel %vm176_vm7, %v815_v57, 0.0 }
 0x84b   :  { %820 = vadd.xlane.f32.xlu0 %v819_v59  ;;  %2579 = vmatprep.subr.bf16.mxu0 %v2578_v6 }
 0x84c   :  { %2581 = vmatpush3.bf16.msra.mxu0 %v2578_v6 }
 0x84d   :  { %2583 = vmatprep.subr.bf16.mxu0 %v2582_v9 }
 0x850   :  { %2585 = vmatpush3.bf16.msra.mxu0 %v2582_v9 }
 0x8d7   :  { %v824_v60 = vpop.xlane.xlu1 %823 }
 0x8d8   :  { %v826_v61 = vmul.f32 0.03125, %v824_v60  ;;  %v821_v62 = vpop.xlane.xlu0 %820 }
 0x8d9   :  { %v825_v63 = vmul.f32 0.03125, %v821_v62 }
 0x8da   :  { %v828_v0 = vsub.f32 %v816_v56, %v826_v61 }
 0x8db   :  { %v827_v1 = vsub.f32 %v815_v57, %v825_v63 }
 0x8dc   :  { %v830_v4 = vmul.f32 %v828_v0, %v828_v0 }
 0x8dd   :  { %v829_v2 = vmul.f32 %v827_v1, %v827_v1 }
 0x8de   :  { %v834_v14 = vsel %vm176_vm7, %v830_v4, 0.0 }
 0x8df   :  { %v831_v3 = vsel %vm176_vm7, %v829_v2, 0.0 }
 0x8e0   :  { %832 = vadd.xlane.f32.xlu0 %v831_v3 }
 0x8e4   :  { %835 = vadd.xlane.f32.xlu0 %v834_v14  ;;  %v2183_v14 = vld [vmem:[%s3124_s4 + $0x7] ss:$0 sm:$0xff] }
 0x96d   :  { %v833_v10 = vpop.xlane.xlu0 %832 }
 0x96e   :  { %v837_v11 = vmul.f32 0.03125, %v833_v10 }
 0x970   :  { %v839_v13 = vadd.f32 1e-12, %v837_v11 }
 0x971   :  { %v836_v15 = vpop.xlane.xlu0 %835 }
 0x972   :  { %2746 = vrsqrt.f32 %v839_v13  ;;  %v838_v16 = vmul.f32 0.03125, %v836_v15 }
 0x974   :  { %v840_v17 = vadd.f32 1e-12, %v838_v16 }
 0x976   :  { %2748 = vrsqrt.f32 %v840_v17 }
 0x97c   :  { %v2747_v18 = vpop.eup %2746 }
 0x97d   :  { %v843_v22 = vmul.f32 %v2747_v18, %v827_v1 }
 0x97f   :  { %v849_v24 = vmul.f32 %v2178_v19, %v843_v22 }
 0x980   :  { %v2749_v25 = vpop.eup %2748 }
 0x981   :  { %v844_v26 = vmul.f32 %v2749_v25, %v828_v0  ;;  %v855_v20 = vadd.f32 %v2179_v23, %v849_v24 }
 0x983   :  { %v850_v28 = vmul.f32 %v2178_v19, %v844_v26  ;;  %2406 = vmatprep.mubr.msk.f32.mxu0 %vm176_vm7, %v855_v20  ;;  %v1102_v26 = vld [vmem:[#allocation2 + $0xe8] sm:$0xff] }
 0x985   :  { %v856_v30 = vadd.f32 %v2179_v23, %v850_v28 }
 0x987   :  { %2407 = vmatmul.mubr.msk.f32.vlgmr.msra.gmra.mrb[4].mxu0 %vm176_vm7, %v856_v30 }
 0xa5a   :  { %v2408_v47 = vpop.f32.mrb[4].mxu0 }
 0xa5b   :  { %v944_v48 = vadd.f32 %v2408_v47, %v2180_v46  ;;  %v938_v49 = vpop.f32.mrb[5].mxu0  ;;  %v2187_v47 = vld [vmem:[%s3124_s4 + $0x9] ss:$0 sm:$0xff] }
 0xa5c   :  { %v939_v50 = vadd.f32 %v2180_v46, %v938_v49 }
 0xa5d   :  { %v950_v51 = vmul.f32 0.044715, %v944_v48  ;;  %v948_v2 = vmul.f32 0.5, %v944_v48 }
 0xa5e   :  { %v949_v52 = vmul.f32 0.044715, %v939_v50  ;;  %v947_v0 = vmul.f32 0.5, %v939_v50 }
 0xa5f   :  { %v952_v53 = vmul.f32 %v950_v51, %v944_v48 }
 0xa60   :  { %v951_v54 = vmul.f32 %v949_v52, %v939_v50  ;;  %v2188_v52 = vld [vmem:[%s3124_s4 + $0xa] ss:$0 sm:$0xff] }
 0xa61   :  { %v954_v55 = vmul.f32 %v952_v53, %v944_v48 }
 0xa62   :  { %v953_v56 = vmul.f32 %v951_v54, %v939_v50 }
 0xa63   :  { %v956_v57 = vadd.f32 %v954_v55, %v944_v48 }
 0xa64   :  { %v955_v58 = vadd.f32 %v953_v56, %v939_v50 }
 0xa65   :  { %v958_v59 = vmul.f32 0.7978846, %v956_v57 }
 0xa66   :  { %v957_v60 = vmul.f32 0.7978846, %v955_v58 }
 0xa67   :  { %2750 = vtanh.f32 %v958_v59 }
 0xa68   :  { %2752 = vtanh.f32 %v957_v60 }
 0xa71   :  { %v2751_v61 = vpop.eup %2750 }
 0xa72   :  { %v2753_v62 = vpop.eup %2752  ;;  %v962_v63 = vadd.f32 1.0, %v2751_v61 }
 0xa73   :  { %v961_v1 = vadd.f32 1.0, %v2753_v62 }
 0xa74   :  { %v964_v4 = vmul.f32 %v962_v63, %v948_v2 }
 0xa75   :  { %v963_v3 = vmul.f32 %v961_v1, %v947_v0 }
 0xa77   :  { %2425 = vmatprep.mubr.msk.f32.mxu1 %vm978_vm10, %v963_v3 }
 0xa78   :  { %2426 = vmatmul.mubr.msk.f32.vlgmr.msra.gmra.mrb[10].mxu1 %vm978_vm10, %v964_v4 }
 0xb4b   :  { %v2427_v12 = vpop.f32.mrb[10].mxu1 }
 0xb4c   :  { %v1057_v5 = vadd.f32 %v2427_v12, %v2183_v14  ;;  %v1051_v6 = vpop.f32.mrb[11].mxu1 }
 0xb4d   :  { %v1052_v7 = vadd.f32 %v2183_v14, %v1051_v6 }
 0xb4e   :  { %v1061_v8 = vadd.f32 %v1057_v5, %v856_v30  ;;  %v1104_v30 = vld [vmem:[#allocation2 + $0xf8] sm:$0xff] }
 0xb4f   :  { %v1060_v9 = vadd.f32 %v1052_v7, %v855_v20  ;;  %v1103_v20 = vld [vmem:[#allocation2 + $0xf0] sm:$0xff]  ;;  %v2606_v33 = vpack.c.bf16 %v1105_v31, %v1104_v30 }
 0xb50   :  { %v1067_v10 = vsel %vm176_vm7, %v1061_v8, 0.0  ;;  %v2602_v28 = vpack.c.bf16 %v1103_v20, %v1102_v26 }
 0xb51   :  { %1068 = vadd.xlane.f32.xlu0 %v1067_v10  ;;  %v1064_v11 = vsel %vm176_vm7, %v1060_v9, 0.0 }
 0xb52   :  { %1065 = vadd.xlane.f32.xlu1 %v1064_v11  ;;  %2603 = vmatprep.subr.bf16.mxu0 %v2602_v28 }
 0xb53   :  { %2605 = vmatpush3.bf16.msra.mxu0 %v2602_v28 }
 0xb54   :  { %2607 = vmatprep.subr.bf16.mxu0 %v2606_v33 }
 0xb57   :  { %2609 = vmatpush3.bf16.msra.mxu0 %v2606_v33 }
 0xbde   :  { %v1069_v13 = vpop.xlane.xlu0 %1068 }
 0xbdf   :  { %v1071_v15 = vmul.f32 0.03125, %v1069_v13  ;;  %v1066_v16 = vpop.xlane.xlu1 %1065 }
 0xbe0   :  { %v1070_v17 = vmul.f32 0.03125, %v1066_v16 }
 0xbe1   :  { %v1073_v18 = vsub.f32 %v1061_v8, %v1071_v15 }
 0xbe2   :  { %v1072_v19 = vsub.f32 %v1060_v9, %v1070_v17 }
 0xbe3   :  { %v1075_v22 = vmul.f32 %v1073_v18, %v1073_v18 }
 0xbe4   :  { %v1074_v23 = vmul.f32 %v1072_v19, %v1072_v19 }
 0xbe5   :  { %v1079_v24 = vsel %vm176_vm7, %v1075_v22, 0.0 }
 0xbe6   :  { %1080 = vadd.xlane.f32.xlu0 %v1079_v24  ;;  %v1076_v25 = vsel %vm176_vm7, %v1074_v23, 0.0 }
 0xbe7   :  { %1077 = vadd.xlane.f32.xlu1 %v1076_v25 }
 0xc73   :  { %v1081_v34 = vpop.xlane.xlu0 %1080 }
 0xc74   :  { %v1083_v35 = vmul.f32 0.03125, %v1081_v34  ;;  %v1078_v37 = vpop.xlane.xlu1 %1077 }
 0xc75   :  { %v1082_v38 = vmul.f32 0.03125, %v1078_v37 }
 0xc76   :  { %v1085_v39 = vadd.f32 1e-12, %v1083_v35 }
 0xc77   :  { %v1084_v41 = vadd.f32 1e-12, %v1082_v38 }
 0xc78   :  { %2754 = vrsqrt.f32 %v1085_v39 }
 0xc79   :  { %2756 = vrsqrt.f32 %v1084_v41 }
 0xc82   :  { %v2755_v42 = vpop.eup %2754 }
 0xc83   :  { %v2757_v44 = vpop.eup %2756  ;;  %v1089_v45 = vmul.f32 %v2755_v42, %v1073_v18 }
 0xc84   :  { %v1088_v46 = vmul.f32 %v2757_v44, %v1072_v19 }
 0xc85   :  { %v1095_v48 = vmul.f32 %v2186_v43, %v1089_v45 }
 0xc86   :  { %v1094_v49 = vmul.f32 %v2186_v43, %v1088_v46 }
 0xc87   :  { %v3015_v51 = vadd.f32 %v2187_v47, %v1095_v48 }
 0xc88   :  { %v3013_v50 = vadd.f32 %v2187_v47, %v1094_v49 }
 0xc8a   :  { %2436 = vmatprep.mubr.msk.f32.mxu0 %vm176_vm7, %v3013_v50 }
 0xc8b   :  { %2437 = vmatmul.mubr.msk.f32.vlgmr.msra.gmra.mrb[6].mxu0 %vm176_vm7, %v3015_v51 }
 0xd5e   :  { %v2438_v53 = vpop.f32.mrb[6].mxu0 }
 0xd5f   :  { %v1189_v54 = vadd.f32 %v2438_v53, %v2188_v52  ;;  %v1183_v55 = vpop.f32.mrb[7].mxu0 }
 0xd60   :  { %v1184_v56 = vadd.f32 %v2188_v52, %v1183_v55 }
 0xd62   :  { %2443 = vmatprep.mubr.msk.f32.mxu0 %vm314_vm8, %v1184_v56  ;;  %v3025_v57 = vpack.i.bf16 %v1189_v54, %v1184_v56 }
 0xd64   :  { %2712 = vrot.lane.b32.xlu0 %v3025_v57, %s2815_s18  ;;  %2707 = vrot.lane.b32.xlu1 %v3025_v57, %s2816_s19 }
 0xd68   :  { %1394 = vrot.lane.b32.xlu1 %v1184_v56, %s2817_s20 }
 0xd6c   :  { %1396 = vrot.lane.b32.xlu1 %v1189_v54, %s2817_s20 }
 0xdd6   :  { %v2713_v58 = vpop.permute.xlu0 %2712  ;;  %v2708_v59 = vpop.permute.xlu1 %2707 }
 0xdd7   :  { %v2715_v60 = vunpack.i.h.bf16 %v2713_v58  ;;  %v2714_v61 = vunpack.i.l.bf16 %v2713_v58  ;;  %v2710_v62 = vunpack.i.h.bf16 %v2708_v59  ;;  %v2709_v63 = vunpack.i.l.bf16 %v2708_v59 }
 0xdd9   :  { %v2610_v0 = vpack.c.bf16 %v2710_v62, %v2709_v63  ;;  %v2620_v1 = vpack.c.bf16 %v2715_v60, %v2714_v61 }
 0xdda   :  { %v1395_v2 = vpop.permute.xlu1 %1394 }
 0xddb   :  { %2612 = vmatprep.subr.msk.bf16.mxu0 %vm2927_vm9, %v2610_v0 }
 0xddc   :  { %2615 = vmatpush3.bf16.xpose.msk.msra.mxu0 %vm2927_vm9, %v2610_v0 }
 0xddd   :  { %2622 = vmatprep.subr.msk.bf16.mxu0 %vm2927_vm9, %v2620_v1 }
 0xdde   :  { %v1397_v3 = vpop.permute.xlu1 %1396 }
 0xde3   :  { %2444 = vmatmul.mubr.msk.f32.vlgmr.msra.gmra.mrb[8].mxu0 %vm314_vm8, %v1189_v54 }
 0xde4   :  { %2625 = vmatpush3.bf16.xpose.msk.msra.mxu0 %vm2927_vm9, %v2620_v1  ;;  %2457 = vmatprep.mubr.msk.f32.mxu0 %vm314_vm8, %v1395_v2  ;;  %v1608_v1 = vld [vmem:[#allocation2 + $0x108] sm:$0xff]  ;;  %v1609_v2 = vld [vmem:[#allocation2 + $0x110] sm:$0xff] }
 0xdeb   :  { %2458 = vmatmul.mubr.msk.f32.vlgmr.msra.gmra.mrb[10].mxu0 %vm314_vm8, %v1397_v3  ;;  %v2630_v3 = vpack.c.bf16 %v1609_v2, %v1608_v1  ;;  %v1852_v1 = vld [vmem:[#allocation2 + $0x168] sm:$0xff]  ;;  %v1853_v2 = vld [vmem:[#allocation2 + $0x170] sm:$0xff] }
 0xeb6   :  { %v2445_v4 = vpop.f32.mrb[8].mxu0 }
 0xeb7   :  { %v1282_v14 = vmul.f32 0.25, %v2445_v4  ;;  %v1272_v12 = vpop.f32.mrb[9].mxu0  ;;  %v1610_v4 = vld [vmem:[#allocation2 + $0x118] sm:$0xff] }
 0xeb8   :  { %v1281_v5 = vmul.f32 0.25, %v1272_v12 }
 0xeb9   :  { %v1284_v6 = vadd.f32 %v1282_v14, %v2945_v36  ;;  %v1611_v14 = vld [vmem:[#allocation2 + $0x120] sm:$0xff] }
 0xeba   :  { %v1283_v7 = vadd.f32 %v1281_v5, %v2950_v40  ;;  %v2634_v12 = vpack.c.bf16 %v1611_v14, %v1610_v4  ;;  %v1854_v4 = vld [vmem:[#allocation2 + $0x178] sm:$0xff]  ;;  %v1855_v14 = vld [vmem:[#allocation2 + $0x180] sm:$0xff] }
 0xebb   :  { %v1288_v8 = vsel %vm314_vm8, %v1284_v6, -inf }
 0xebc   :  { %1289 = vmax.xlane.f32.xlu1 %v1288_v8  ;;  %v1285_v9 = vsel %vm314_vm8, %v1283_v7, -inf }
 0xebd   :  { %1286 = vmax.xlane.f32.xlu0 %v1285_v9 }
 0xebe   :  { %v2459_v29 = vpop.f32.mrb[10].mxu0 }
 0xebf   :  { %v1476_v10 = vpop.f32.mrb[11].mxu0  ;;  %v1486_v11 = vmul.f32 0.25, %v2459_v29 }
 0xec0   :  { %v1485_v13 = vmul.f32 0.25, %v1476_v10 }
 0xec1   :  { %v1488_v17 = vadd.f32 %v1486_v11, %v2945_v36 }
 0xec2   :  { %v1487_v15 = vadd.f32 %v1485_v13, %v2950_v40  ;;  %v2203_v13 = vld [vmem:[%s3124_s4 + $0xb] ss:$0 sm:$0xff] }
 0xec3   :  { %v1492_v18 = vsel %vm314_vm8, %v1488_v17, -inf }
 0xec4   :  { %v1489_v16 = vsel %vm314_vm8, %v1487_v15, -inf }
 0xec5   :  { %1490 = vmax.xlane.f32.xlu0 %v1489_v16 }
 0xec9   :  { %1493 = vmax.xlane.f32.xlu0 %v1492_v18 }
 0xf49   :  { %v1290_v19 = vpop.xlane.xlu1 %1289 }
 0xf4a   :  { %v1292_v22 = vsub.f32 %v1284_v6, %v1290_v19  ;;  %v1287_v23 = vpop.xlane.xlu0 %1286 }
 0xf4b   :  { %v1291_v24 = vsub.f32 %v1283_v7, %v1287_v23 }
 0xf4c   :  { %v1295_v25 = vmul.f32 1.442695, %v1292_v22 }
 0xf4d   :  { %v1293_v26 = vmul.f32 1.442695, %v1291_v24 }
 0xf4e   :  { %2758 = vpow2.f32 %v1295_v25 }
 0xf4f   :  { %2760 = vpow2.f32 %v1293_v26 }
 0xf52   :  { %v1491_v20 = vpop.xlane.xlu0 %1490 }
 0xf53   :  { %v1495_v28 = vsub.f32 %v1487_v15, %v1491_v20 }
 0xf55   :  { %v1497_v30 = vmul.f32 1.442695, %v1495_v28 }
 0xf56   :  { %v1494_v40 = vpop.xlane.xlu0 %1493 }
 0xf57   :  { %2762 = vpow2.f32 %v1497_v30  ;;  %v1496_v31 = vsub.f32 %v1488_v17, %v1494_v40 }
 0xf58   :  { %v2759_v33 = vpop.eup %2758 }
 0xf59   :  { %v2761_v36 = vpop.eup %2760  ;;  %v1499_v34 = vmul.f32 1.442695, %v1496_v31  ;;  %v1300_v35 = vsel %vm314_vm8, %v2759_v33, 0.0 }
 0xf5a   :  { %1301 = vadd.xlane.f32.xlu0 %v1300_v35  ;;  %v1297_v37 = vsel %vm314_vm8, %v2761_v36, 0.0 }
 0xf5b   :  { %2764 = vpow2.f32 %v1499_v34  ;;  %1298 = vadd.xlane.f32.xlu1 %v1297_v37  ;;  %v1741_v34 = vld [vmem:[#allocation2 + $0x130] sm:$0xff]  ;;  %v1742_v37 = vld [vmem:[#allocation2 + $0x138] sm:$0xff] }
 0xf61   :  { %v2763_v38 = vpop.eup %2762 }
 0xf62   :  { %v1501_v39 = vsel %vm314_vm8, %v2763_v38, 0.0 }
 0xf63   :  { %1502 = vadd.xlane.f32.xlu1 %v1501_v39 }
 0xf65   :  { %v2765_v41 = vpop.eup %2764 }
 0xf66   :  { %v1504_v42 = vsel %vm314_vm8, %v2765_v41, 0.0 }
 0xf67   :  { %1505 = vadd.xlane.f32.xlu0 %v1504_v42 }
 0xf74   :  { %2717 = vrot.lane.b32.xlu1 %v3025_v57, %s2818_s2 }
 0xf7d   :  { %2722 = vrot.lane.b32.xlu0 %v3025_v57, %s2819_s25 }
 0xfe7   :  { %v1302_v44 = vpop.xlane.xlu0 %1301 }
 0xfe8   :  { %v1299_v43 = vpop.xlane.xlu1 %1298 }
 0xfe9   :  { %2766 = vrcp.f32 %v1299_v43 }
 0xfea   :  { %2768 = vrcp.f32 %v1302_v44 }
 0xff0   :  { %v1503_v45 = vpop.xlane.xlu1 %1502 }
 0xff1   :  { %2770 = vrcp.f32 %v1503_v45 }
 0xff3   :  { %v2767_v46 = vpop.eup %2766 }
 0xff4   :  { %v2718_v47 = vpop.permute.xlu1 %2717  ;;  %v1506_v48 = vpop.xlane.xlu0 %1505  ;;  %v1304_v49 = vmul.f32 %v2767_v46, %v2761_v36 }
 0xff5   :  { %v2720_v52 = vunpack.i.h.bf16 %v2718_v47  ;;  %v2719_v53 = vunpack.i.l.bf16 %v2718_v47  ;;  %2772 = vrcp.f32 %v1506_v48  ;;  %v2769_v55 = vpop.eup %2768  ;;  %v2206_v48 = vld [vmem:[%s3124_s4 + $0xc] ss:$0 sm:$0xff] }
 0xff6   :  { %2450 = vmatprep.mubr.msk.f32.mxu1 %vm314_vm8, %v1304_v49  ;;  %v1306_v60 = vmul.f32 %v2769_v55, %v2759_v33 }
 0xff7   :  { %v2616_v54 = vpack.c.bf16 %v2720_v52, %v2719_v53  ;;  %v2207_v52 = vld [vmem:[%s3124_s4 + $0xd] ss:$0 sm:$0xff] }
 0xff8   :  { %v2723_v56 = vpop.permute.xlu0 %2722 }
 0xff9   :  { %v2725_v58 = vunpack.i.h.bf16 %v2723_v56  ;;  %v2724_v57 = vunpack.i.l.bf16 %v2723_v56  ;;  %2617 = vmatprep.subr.bf16.mxu1 %v2616_v54 }
 0xffa   :  { %2619 = vmatpush3.bf16.msra.mxu1 %v2616_v54 }
 0xffb   :  { %v2771_v59 = vpop.eup %2770  ;;  %v2626_v61 = vpack.c.bf16 %v2725_v58, %v2724_v57 }
 0xffc   :  { %v1508_v62 = vmul.f32 %v2771_v59, %v2763_v38  ;;  %v1743_v38 = vld [vmem:[#allocation2 + $0x140] sm:$0xff]  ;;  %v1848_v59 = vld [vmem:[#allocation2 + $0x148] sm:$0xff] }
 0xffd   :  { %2451 = vmatmul.mubr.msk.f32.vlgmr.msra.gmra.mrb[12].mxu1 %vm314_vm8, %v1306_v60  ;;  %2627 = vmatprep.subr.bf16.mxu1 %v2626_v61  ;;  %v2642_v39 = vpack.c.bf16 %v1743_v38, %v1742_v37  ;;  %v1849_v60 = vld [vmem:[#allocation2 + $0x150] sm:$0xff] }
 0xffe   :  { %2629 = vmatpush3.bf16.msra.mxu1 %v2626_v61  ;;  %2464 = vmatprep.mubr.msk.f32.mxu1 %vm314_vm8, %v1508_v62  ;;  %v2646_v61 = vpack.c.bf16 %v1849_v60, %v1848_v59  ;;  %v1850_v62 = vld [vmem:[#allocation2 + $0x158] sm:$0xff]  ;;  %v2214_v60 = vld [vmem:[%s3124_s4 + $0x10] ss:$0 sm:$0xff] }
 0xfff   :  { %v2773_v63 = vpop.eup %2772  ;;  %2631 = vmatprep.subr.bf16.mxu1 %v2630_v3 }
0x1000   :  { %v1510_v0 = vmul.f32 %v2773_v63, %v2765_v41  ;;  %v1851_v63 = vld [vmem:[#allocation2 + $0x160] sm:$0xff] }
0x1002   :  { %2465 = vmatmul.mubr.msk.f32.vlgmr.msra.gmra.mrb[14].mxu1 %vm314_vm8, %v1510_v0  ;;  %v2650_v0 = vpack.c.bf16 %v1851_v63, %v1850_v62 }
0x1003   :  { %2633 = vmatpush3.bf16.msra.mxu1 %v2630_v3  ;;  %v2654_v3 = vpack.c.bf16 %v1853_v2, %v1852_v1  ;;  %v1984_v2 = vmul.u32 8, %v2877_v21 }
0x1004   :  { %2635 = vmatprep.subr.bf16.mxu1 %v2634_v12 }
0x1005   :  { %vm1985_vm12 = vcmp.eq.s32.totalorder %v2881_v27, %v1984_v2 }
0x1007   :  { %2637 = vmatpush3.bf16.msra.mxu1 %v2634_v12  ;;  %v2658_v12 = vpack.c.bf16 %v1855_v14, %v1854_v4 }
0x1008   :  { %2647 = vmatprep.subr.bf16.mxu1 %v2646_v61 }
0x10d0   :  { %v2452_v5 = vpop.f32.mrb[12].mxu1 }
0x10d1   :  { %v1385_v6 = vpop.f32.mrb[13].mxu1 }
0x10d5   :  { %v2466_v7 = vpop.f32.mrb[14].mxu1 }
0x10d6   :  { %v1589_v8 = vpop.f32.mrb[15].mxu1 }
0x10d7   :  { %1600 = vrot.lane.b32.xlu1 %v1589_v8, %s2820_s26 }
0x10db   :  { %1602 = vrot.lane.b32.xlu1 %v2466_v7, %s2820_s26 }
0x1149   :  { %v1601_v9 = vpop.permute.xlu1 %1600 }
0x114a   :  { %v1606_v29 = vsel %vm314_vm8, %v1385_v6, %v1601_v9 }
0x114b   :  { %2475 = vmatprep.mubr.msk.f32.mxu1 %vm176_vm7, %v1606_v29 }
0x114d   :  { %v1603_v10 = vpop.permute.xlu1 %1602 }
0x114e   :  { %v1607_v11 = vsel %vm314_vm8, %v2452_v5, %v1603_v10  ;;  %v2208_v5 = vld [vmem:[%s3124_s4 + $0xe] ss:$0 sm:$0xff] }
0x114f   :  { %2476 = vmatmul.mubr.msk.f32.vlgmr.msra.gmra.mrb[16].mxu1 %vm176_vm7, %v1607_v11 }
0x1150   :  { %2649 = vmatpush3.bf16.msra.mxu1 %v2646_v61 }
0x1151   :  { %2651 = vmatprep.subr.bf16.mxu1 %v2650_v0 }
0x1154   :  { %2653 = vmatpush3.bf16.msra.mxu1 %v2650_v0  ;;  %v2215_v0 = vld [vmem:[%s3124_s4 + $0x11] ss:$0 sm:$0xff] }
0x1155   :  { %2655 = vmatprep.subr.bf16.mxu1 %v2654_v3 }
0x1158   :  { %2657 = vmatpush3.bf16.msra.mxu1 %v2654_v3 }
0x1159   :  { %2659 = vmatprep.subr.bf16.mxu1 %v2658_v12 }
0x115c   :  { %2661 = vmatpush3.bf16.msra.mxu1 %v2658_v12  ;;  %v2061_v12 = vld [vmem:[#allocation2 + $0x188] sm:$0xff] }
0x1222   :  { %v2477_v15 = vpop.f32.mrb[16].mxu1 }
0x1223   :  { %v1695_v16 = vadd.f32 %v2477_v15, %v2203_v13  ;;  %v1689_v17 = vpop.f32.mrb[17].mxu1 }
0x1224   :  { %v1690_v18 = vadd.f32 %v2203_v13, %v1689_v17 }
0x1225   :  { %v1699_v19 = vadd.f32 %v1695_v16, %v3015_v51 }
0x1226   :  { %v1698_v22 = vadd.f32 %v1690_v18, %v3013_v50  ;;  %v1740_v50 = vld [vmem:[#allocation2 + $0x128] sm:$0xff] }
0x1227   :  { %v1705_v23 = vsel %vm176_vm7, %v1699_v19, 0.0  ;;  %v2638_v35 = vpack.c.bf16 %v1741_v34, %v1740_v50 }
0x1228   :  { %1706 = vadd.xlane.f32.xlu1 %v1705_v23  ;;  %v1702_v24 = vsel %vm176_vm7, %v1698_v22, 0.0 }
0x1229   :  { %1703 = vadd.xlane.f32.xlu0 %v1702_v24  ;;  %2639 = vmatprep.subr.bf16.mxu0 %v2638_v35 }
0x122a   :  { %2641 = vmatpush3.bf16.msra.mxu0 %v2638_v35 }
0x122b   :  { %2643 = vmatprep.subr.bf16.mxu0 %v2642_v39 }
0x122e   :  { %2645 = vmatpush3.bf16.msra.mxu0 %v2642_v39 }
0x12b5   :  { %v1707_v25 = vpop.xlane.xlu1 %1706 }
0x12b6   :  { %v1709_v26 = vmul.f32 0.03125, %v1707_v25  ;;  %v1704_v20 = vpop.xlane.xlu0 %1703 }
0x12b7   :  { %v1708_v28 = vmul.f32 0.03125, %v1704_v20 }
0x12b8   :  { %v1711_v30 = vsub.f32 %v1699_v19, %v1709_v26 }
0x12b9   :  { %v1710_v40 = vsub.f32 %v1698_v22, %v1708_v28 }
0x12ba   :  { %v1713_v36 = vmul.f32 %v1711_v30, %v1711_v30 }
0x12bb   :  { %v1712_v31 = vmul.f32 %v1710_v40, %v1710_v40 }
0x12bc   :  { %v1717_v51 = vsel %vm176_vm7, %v1713_v36, 0.0 }
0x12bd   :  { %v1714_v33 = vsel %vm176_vm7, %v1712_v31, 0.0  ;;  %v2211_v31 = vld [vmem:[%s3124_s4 + $0xf] ss:$0 sm:$0xff] }
0x12be   :  { %1715 = vadd.xlane.f32.xlu0 %v1714_v33 }
0x12c2   :  { %1718 = vadd.xlane.f32.xlu0 %v1717_v51 }
0x134b   :  { %v1716_v41 = vpop.xlane.xlu0 %1715 }
0x134c   :  { %v1720_v42 = vmul.f32 0.03125, %v1716_v41 }
0x134e   :  { %v1722_v43 = vadd.f32 1e-12, %v1720_v42 }
0x134f   :  { %v1719_v44 = vpop.xlane.xlu0 %1718 }
0x1350   :  { %2774 = vrsqrt.f32 %v1722_v43  ;;  %v1721_v45 = vmul.f32 0.03125, %v1719_v44 }
0x1352   :  { %v1723_v46 = vadd.f32 1e-12, %v1721_v45 }
0x1354   :  { %2776 = vrsqrt.f32 %v1723_v46 }
0x135a   :  { %v2775_v47 = vpop.eup %2774 }
0x135b   :  { %v1726_v49 = vmul.f32 %v2775_v47, %v1710_v40 }
0x135d   :  { %v1732_v53 = vmul.f32 %v2206_v48, %v1726_v49 }
0x135e   :  { %v2777_v54 = vpop.eup %2776 }
0x135f   :  { %v1727_v55 = vmul.f32 %v2777_v54, %v1711_v30  ;;  %v1738_v56 = vadd.f32 %v2207_v52, %v1732_v53 }
0x1361   :  { %v1733_v58 = vmul.f32 %v2206_v48, %v1727_v55  ;;  %2486 = vmatprep.mubr.msk.f32.mxu0 %vm176_vm7, %v1738_v56 }
0x1363   :  { %v1739_v57 = vadd.f32 %v2207_v52, %v1733_v58  ;;  %v2821_v52 = vmov 0.0|0.0  }
0x1364   :  { %2662 = vmatprep.subr.bf16.mxu0 %v2821_v52 }
0x1365   :  { %2487 = vmatmul.mubr.msk.f32.vlgmr.msra.gmra.mrb[12].mxu0 %vm176_vm7, %v1739_v57 }
0x1366   :  { %2512 = vmatprep.mubr.msk.f32.mxu0 %vm2822_vm11, %v2814_v32 }
0x1438   :  { %v2488_v6 = vpop.f32.mrb[12].mxu0 }
0x1439   :  { %v1827_v7 = vadd.f32 %v2488_v6, %v2208_v5  ;;  %v1821_v8 = vpop.f32.mrb[13].mxu0 }
0x143a   :  { %v1822_v9 = vadd.f32 %v2208_v5, %v1821_v8  ;;  %v2062_v5 = vld [vmem:[#allocation2 + $0x190] sm:$0xff] }
0x143b   :  { %v1833_v29 = vmul.f32 0.044715, %v1827_v7  ;;  %v1831_v28 = vmul.f32 0.5, %v1827_v7  ;;  %v2666_v8 = vpack.c.bf16 %v2062_v5, %v2061_v12 }
0x143c   :  { %v1832_v10 = vmul.f32 0.044715, %v1822_v9  ;;  %v1830_v26 = vmul.f32 0.5, %v1822_v9 }
0x143d   :  { %v1835_v11 = vmul.f32 %v1833_v29, %v1827_v7  ;;  %v2064_v29 = vld [vmem:[#allocation2 + $0x1a0] sm:$0xff] }
0x143e   :  { %v1834_v13 = vmul.f32 %v1832_v10, %v1822_v9 }
0x143f   :  { %v1837_v15 = vmul.f32 %v1835_v11, %v1827_v7  ;;  %v2218_v11 = vld [vmem:[%s3124_s4 + $0x12] ss:$0 sm:$0xff] }
0x1440   :  { %v1836_v16 = vmul.f32 %v1834_v13, %v1822_v9 }
0x1441   :  { %v1839_v17 = vadd.f32 %v1837_v15, %v1827_v7  ;;  %v2216_v7 = vsel %vm1985_vm12, 1.0, %v2814_v32 }
0x1442   :  { %v1838_v18 = vadd.f32 %v1836_v16, %v1822_v9  ;;  %v2063_v9 = vld [vmem:[#allocation2 + $0x198] sm:$0xff] }
0x1443   :  { %v1841_v19 = vmul.f32 0.7978846, %v1839_v17  ;;  %v2669_v10 = vpack.c.bf16 %v2064_v29, %v2063_v9 }
0x1444   :  { %v1840_v22 = vmul.f32 0.7978846, %v1838_v18 }
0x1445   :  { %2778 = vtanh.f32 %v1841_v19 }
0x1446   :  { %2780 = vtanh.f32 %v1840_v22 }
0x144f   :  { %v2779_v23 = vpop.eup %2778 }
0x1450   :  { %v2781_v24 = vpop.eup %2780  ;;  %v1845_v25 = vadd.f32 1.0, %v2779_v23 }
0x1451   :  { %v1844_v20 = vadd.f32 1.0, %v2781_v24 }
0x1452   :  { %v1847_v40 = vmul.f32 %v1845_v25, %v1831_v28 }
0x1453   :  { %v1846_v30 = vmul.f32 %v1844_v20, %v1830_v26 }
0x1455   :  { %2505 = vmatprep.mubr.msk.f32.mxu1 %vm978_vm10, %v1846_v30 }
0x1456   :  { %2506 = vmatmul.mubr.msk.f32.vlgmr.msra.gmra.mrb[18].mxu1 %vm978_vm10, %v1847_v40 }
0x1529   :  { %v2507_v33 = vpop.f32.mrb[18].mxu1 }
0x152a   :  { %v1939_v36 = vadd.f32 %v2507_v33, %v2211_v31  ;;  %v1933_v51 = vpop.f32.mrb[19].mxu1 }
0x152b   :  { %v1934_v50 = vadd.f32 %v2211_v31, %v1933_v51 }
0x152c   :  { %v1943_v34 = vadd.f32 %v1939_v36, %v1739_v57 }
0x152d   :  { %v1942_v35 = vadd.f32 %v1934_v50, %v1738_v56 }
0x152e   :  { %v1949_v37 = vsel %vm176_vm7, %v1943_v34, 0.0 }
0x152f   :  { %1950 = vadd.xlane.f32.xlu0 %v1949_v37  ;;  %v1946_v38 = vsel %vm176_vm7, %v1942_v35, 0.0 }
0x1530   :  { %1947 = vadd.xlane.f32.xlu1 %v1946_v38 }
0x15bc   :  { %v1951_v39 = vpop.xlane.xlu0 %1950 }
0x15bd   :  { %v1953_v41 = vmul.f32 0.03125, %v1951_v39  ;;  %v1948_v42 = vpop.xlane.xlu1 %1947 }
0x15be   :  { %v1952_v43 = vmul.f32 0.03125, %v1948_v42 }
0x15bf   :  { %v1955_v44 = vsub.f32 %v1943_v34, %v1953_v41 }
0x15c0   :  { %v1954_v45 = vsub.f32 %v1942_v35, %v1952_v43 }
0x15c1   :  { %v1957_v46 = vmul.f32 %v1955_v44, %v1955_v44 }
0x15c2   :  { %v1956_v47 = vmul.f32 %v1954_v45, %v1954_v45 }
0x15c3   :  { %v1961_v48 = vsel %vm176_vm7, %v1957_v46, 0.0 }
0x15c4   :  { %1962 = vadd.xlane.f32.xlu0 %v1961_v48  ;;  %v1958_v49 = vsel %vm176_vm7, %v1956_v47, 0.0 }
0x15c5   :  { %1959 = vadd.xlane.f32.xlu1 %v1958_v49 }
0x1651   :  { %v1963_v53 = vpop.xlane.xlu0 %1962 }
0x1652   :  { %v1965_v54 = vmul.f32 0.03125, %v1963_v53  ;;  %v1960_v55 = vpop.xlane.xlu1 %1959 }
0x1653   :  { %v1964_v56 = vmul.f32 0.03125, %v1960_v55 }
0x1654   :  { %v1967_v58 = vadd.f32 1e-12, %v1965_v54 }
0x1655   :  { %v1966_v57 = vadd.f32 1e-12, %v1964_v56 }
0x1656   :  { %2782 = vrsqrt.f32 %v1967_v58 }
0x1657   :  { %2784 = vrsqrt.f32 %v1966_v57 }
0x1660   :  { %v2783_v59 = vpop.eup %2782 }
0x1661   :  { %v2785_v61 = vpop.eup %2784  ;;  %v1971_v62 = vmul.f32 %v2783_v59, %v1955_v44 }
0x1662   :  { %v1970_v63 = vmul.f32 %v2785_v61, %v1954_v45 }
0x1663   :  { %v1977_v1 = vmul.f32 %v2214_v60, %v1971_v62 }
0x1664   :  { %v1976_v3 = vmul.f32 %v2214_v60, %v1970_v63 }
0x1665   :  { %v1983_v4 = vadd.f32 %v2215_v0, %v1977_v1 }
0x1666   :  { %v1982_v14 = vadd.f32 %v2215_v0, %v1976_v3 }
0x1668   :  { %v2663_v6 = vpack.c.bf16 %v1983_v4, %v1982_v14 }
0x166a   :  { %2664 = vmatpush3.bf16.msra.mxu0 %v2663_v6 }
0x166b   :  { %2665 = vmatprep.subr.bf16.mxu0 %v2821_v52 }
0x166d   :  { %2513 = vmatmul.mubr.msk.f32.vlgmr.msra.gmra.mrb[14].mxu0 %vm314_vm8, %v2216_v7 }
0x166e   :  { %2667 = vmatpush3.bf16.msra.mxu0 %v2666_v8  ;;  %2523 = vmatprep.mubr.msk.f32.mxu0 %vm2822_vm11, %v2814_v32 }
0x166f   :  { %2668 = vmatprep.subr.bf16.mxu0 %v2821_v52 }
0x1672   :  { %2670 = vmatpush3.bf16.msra.mxu0 %v2669_v10 }
0x1740   :  { %v2057_v21 = vpop.f32.mrb[14].mxu0 }
0x1741   :  { %v2514_v27 = vpop.f32.mrb[15].mxu0  ;;  %2524 = vmatmul.mubr.msk.f32.vlgmr.msra.gmra.mrb[16].mxu0 %vm176_vm7, %v2057_v21 }
0x1814   :  { %v2139_v13 = vpop.f32.mrb[16].mxu0 }
0x1815   :  { %v2140_v15 = vadd.f32 %v2218_v11, %v2139_v13  ;;  %v2525_v16 = vpop.f32.mrb[17].mxu0 }
0x1817   :  { %2144 = vst.msk [vmem:[%s3125_s5] sm:$0x3] %vm2143_vm13, %v2140_v15 }
0x1818   :  { %2149 = vsyncpa [#allocation3], 1 }

</bundles_post_ra>
